<compile_context>
chip_gen: v6e
topology: v6e:2x2x1
jax: 0.10.0
libtpu: 0.0.40
codegen_flags: <defaults>
</compile_context>

<pallas_src>
import functools

import jax
import jax.numpy as jnp
from jax.experimental import pallas as pl
from jax.experimental.pallas import tpu as pltpu

D_MODEL = 64
NUM_HEADS = 4
HEAD_DIM = D_MODEL // NUM_HEADS      # 16
D_FF = D_MODEL * 4                   # 256
CONTEXT_LENGTH = 16
EPS = 1e-5                           # nn.LayerNorm default
NEG_INF = -1e30                      # large finite negative for masking


def _layer_norm(x, gamma, beta):
    mean = jnp.mean(x, axis=-1, keepdims=True)
    var = jnp.mean(jnp.square(x - mean), axis=-1, keepdims=True)
    return (x - mean) * jax.lax.rsqrt(var + EPS) * gamma + beta


def transformer_block_kernel(x_ref, wqkv_ref, wo_ref, w1_ref, w2_ref,
                             vecs_ref, b1_ref, out_ref, *, seq_len):
    x = x_ref[...]                               # (M, D) f32, M = BB * T
    m, d = x.shape
    t = seq_len
    bb = m // t

    # Packed (1, D) parameter vectors.
    vecs = vecs_ref[...]                         # (16, D)
    ln1_g, ln1_b = vecs[0:1], vecs[1:2]
    ln2_g, ln2_b = vecs[2:3], vecs[3:4]
    bq, bk, bv, bo = vecs[4:5], vecs[5:6], vecs[6:7], vecs[7:8]
    b2 = vecs[8:9]
    b1 = b1_ref[...]                             # (1, D_FF)

    # ---------------- x + MHA(LN1(x)) ----------------
    h = _layer_norm(x, ln1_g, ln1_b)

    # Fused QKV projection: one (M, D) @ (D, 3D) matmul on bf16 MXU inputs.
    qkv = jnp.dot(h.astype(jnp.bfloat16), wqkv_ref[...].astype(jnp.bfloat16),
                  preferred_element_type=jnp.float32)           # (M, 3D)

    scale = 1.0 / (HEAD_DIM ** 0.5)              # fold softmax scale into q once
    q = (qkv[:, 0 * d:1 * d] + bq) * scale
    k = qkv[:, 1 * d:2 * d] + bk
    v = qkv[:, 2 * d:3 * d] + bv

    # Causal additive mask, built once (broadcast over batch & heads).
    row = jax.lax.broadcasted_iota(jnp.int32, (t, t), 0)
    col = jax.lax.broadcasted_iota(jnp.int32, (t, t), 1)
    mask_add = jnp.where(row >= col, 0.0, NEG_INF).astype(jnp.float32)  # (t, t)

    wo_bf = wo_ref[...].astype(jnp.bfloat16)     # (D, D), cast hoisted

    # Heads: static unrolled loop; batch (BB) handled as an einsum batch dim.
    # Output projection fused into a per-head accumulation (no concat).
    attn = jnp.zeros((m, d), jnp.float32)
    for hd in range(NUM_HEADS):
        sl = slice(hd * HEAD_DIM, (hd + 1) * HEAD_DIM)
        qh = q[:, sl].reshape(bb, t, HEAD_DIM).astype(jnp.bfloat16)
        kh = k[:, sl].reshape(bb, t, HEAD_DIM).astype(jnp.bfloat16)
        vh = v[:, sl].reshape(bb, t, HEAD_DIM).astype(jnp.bfloat16)

        sc = jnp.einsum('bqd,bkd->bqk', qh, kh,
                        preferred_element_type=jnp.float32)     # (BB, T, T)
        sc = sc + mask_add
        sc = sc - jnp.max(sc, axis=-1, keepdims=True)
        p = jnp.exp(sc)
        p = p * pl.reciprocal(jnp.sum(p, axis=-1, keepdims=True), approx=True)

        ctx = jnp.einsum('bqk,bkd->bqd', p.astype(jnp.bfloat16), vh,
                         preferred_element_type=jnp.float32)    # (BB, T, Hd)
        attn = attn + jnp.dot(ctx.reshape(m, HEAD_DIM).astype(jnp.bfloat16),
                              wo_bf[sl, :],
                              preferred_element_type=jnp.float32)

    x1 = x + attn + bo

    # ---------------- x1 + FFN(LN2(x1)) ----------------
    h2 = _layer_norm(x1, ln2_g, ln2_b)
    ff = jnp.dot(h2.astype(jnp.bfloat16), w1_ref[...].astype(jnp.bfloat16),
                 preferred_element_type=jnp.float32) + b1
    ff = jnp.maximum(ff, 0.0)
    ff = jnp.dot(ff.astype(jnp.bfloat16), w2_ref[...].astype(jnp.bfloat16),
                 preferred_element_type=jnp.float32) + b2
    # TODO(synk): dropout is identity here (eval mode); no stochastic masking.
    out_ref[...] = x1 + ff


def _pick_block_batch(batch, seq_len, target_rows=256, min_rows=128):
    """Largest divisor BB of batch whose (BB*T, D) block is legal and <= target rows."""
    divisors = [d for d in range(1, batch + 1) if batch % d == 0]
    legal = [d for d in divisors if d == batch or (d * seq_len) % 8 == 0]
    fitting = [d for d in legal if d * seq_len <= target_rows] or [legal[0]]
    bb = max(fitting)
    if bb == batch:
        # Prefer >= 2 grid steps (v7x has 2 TensorCores) if the MXU M dim stays full.
        smaller = [d for d in fitting if d < batch and d * seq_len >= min_rows]
        if smaller:
            bb = max(smaller)
    return bb


def transformer_block(x, params):
    B, T, D = x.shape
    assert D == D_MODEL and T <= CONTEXT_LENGTH
    (ln1_g, ln1_b, wq, bq, wk, bk, wv, bv, wo, bo,
     ln2_g, ln2_b, w1, b1, w2, b2) = params

    # ---- pack parameters: 17 kernel inputs -> 7 ----
    w_qkv = jnp.concatenate([wq, wk, wv], axis=1)                    # (D, 3D)
    vec_rows = [ln1_g, ln1_b, ln2_g, ln2_b, bq, bk, bv, bo, b2]      # each (1, D)
    vecs = jnp.concatenate(
        vec_rows + [jnp.zeros((16 - len(vec_rows), D_MODEL), jnp.float32)], axis=0)  # (16, D)

    BB = _pick_block_batch(B, T)
    MB = BB * T
    grid = (B // BB,)

    x2 = x.reshape(B * T, D)        # fold batch into the matmul M dimension

    kernel = functools.partial(transformer_block_kernel, seq_len=T)
    rep = lambda i: (0, 0)          # parameters replicated across grid steps

    out2 = pl.pallas_call(
        kernel,
        out_shape=jax.ShapeDtypeStruct((B * T, D), jnp.float32),
        grid=grid,
        in_specs=[
            pl.BlockSpec((MB, D), lambda i: (i, 0)),     # x: BB sequences per step
            pl.BlockSpec((D, 3 * D), rep),               # packed Wq|Wk|Wv
            pl.BlockSpec((D, D), rep),                   # Wo
            pl.BlockSpec((D, D_FF), rep),                # W1
            pl.BlockSpec((D_FF, D), rep),                # W2
            pl.BlockSpec((16, D), rep),                  # packed LN/bias vectors
            pl.BlockSpec((1, D_FF), rep),                # b1
        ],
        out_specs=pl.BlockSpec((MB, D), lambda i: (i, 0)),
        compiler_params=pltpu.CompilerParams(dimension_semantics=("parallel",)),
    )(x2, w_qkv, wo, w1, w2, vecs, b1)
    return out2.reshape(B, T, D)


def make_params(key):
    ks = jax.random.split(key, 16)

    def lin(kw, kb, fan_in, fan_out):
        bound = 1.0 / (fan_in ** 0.5)
        w = jax.random.uniform(kw, (fan_in, fan_out), jnp.float32, -bound, bound)
        b = jax.random.uniform(kb, (1, fan_out), jnp.float32, -bound, bound)
        return w, b

    wq, bq = lin(ks[0], ks[1], D_MODEL, D_MODEL)   # 4 heads packed along columns
    wk, bk = lin(ks[2], ks[3], D_MODEL, D_MODEL)
    wv, bv = lin(ks[4], ks[5], D_MODEL, D_MODEL)
    wo, bo = lin(ks[6], ks[7], D_MODEL, D_MODEL)
    w1, b1 = lin(ks[8], ks[9], D_MODEL, D_FF)
    w2, b2 = lin(ks[10], ks[11], D_FF, D_MODEL)
    ln1_g = jnp.ones((1, D_MODEL), jnp.float32)
    ln1_b = jnp.zeros((1, D_MODEL), jnp.float32)
    ln2_g = jnp.ones((1, D_MODEL), jnp.float32)
    ln2_b = jnp.zeros((1, D_MODEL), jnp.float32)
    return (ln1_g, ln1_b, wq, bq, wk, bk, wv, bv, wo, bo,
            ln2_g, ln2_b, w1, b1, w2, b2)


def transformer_block_ref(x, params):
    (ln1_g, ln1_b, wq, bq, wk, bk, wv, bv, wo, bo,
     ln2_g, ln2_b, w1, b1, w2, b2) = params
    T = x.shape[1]
    h = _layer_norm(x, ln1_g, ln1_b)
    q = h @ wq + bq
    k = h @ wk + bk
    v = h @ wv + bv
    mask = jnp.tril(jnp.ones((T, T), bool))
    outs = []
    for hd in range(NUM_HEADS):
        s = slice(hd * HEAD_DIM, (hd + 1) * HEAD_DIM)
        sc = (q[..., s] @ jnp.swapaxes(k[..., s], -1, -2)) / (HEAD_DIM ** 0.5)
        sc = jnp.where(mask, sc, -jnp.inf)
        outs.append(jax.nn.softmax(sc, axis=-1) @ v[..., s])
    attn = jnp.concatenate(outs, axis=-1) @ wo + bo
    x1 = x + attn
    h2 = _layer_norm(x1, ln2_g, ln2_b)
    ff = jnp.maximum(h2 @ w1 + b1, 0.0) @ w2 + b2
    return x1 + ff


if __name__ == "__main__":
    key = jax.random.PRNGKey(0)
    k_x, k_p = jax.random.split(key)

    B, T = 2, 8
    x = jax.random.normal(k_x, (B, T, D_MODEL), jnp.float32)
    params = make_params(k_p)

    out = transformer_block(x, params)
    out = jax.block_until_ready(out)

    ref = transformer_block_ref(x, params)
    assert out.shape == (B, T, D_MODEL)
    # bf16 MXU inputs (f32 accumulation) + approx reciprocal -> loosened tolerance
    # against the f32 reference, as flagged in the review.
    err = float(jnp.max(jnp.abs(out - ref)))
    assert jnp.allclose(out, ref, atol=5e-2, rtol=5e-2), f"mismatch vs reference, max|err|={err}"

    print("KERNEL_OK")
</pallas_src>

<mosaic_0001>
module attributes {stable_mosaic.version = 11 : i64} {
  func.func @transformer_block_kernel(%arg0: i32, %arg1: memref<16x64xf32, #tpu.memory_space<vmem>>, %arg2: memref<64x192xf32, #tpu.memory_space<vmem>>, %arg3: memref<64x64xf32, #tpu.memory_space<vmem>>, %arg4: memref<64x256xf32, #tpu.memory_space<vmem>>, %arg5: memref<256x64xf32, #tpu.memory_space<vmem>>, %arg6: memref<16x64xf32, #tpu.memory_space<vmem>>, %arg7: memref<1x256xf32, #tpu.memory_space<vmem>>, %arg8: memref<16x64xf32, #tpu.memory_space<vmem>>) attributes {dimension_semantics = [#tpu.dimension_semantics<parallel>], iteration_bounds = array<i64: 1>, scalar_prefetch = 0 : i64, scratch_operands = 0 : i64, tpu.core_type = #tpu.core_type<tc>, window_params = [{transform_indices = @transform_0, window_bounds = array<i64: 16, 64>}, {pipeline_mode = #tpu.pipeline_mode<synchronous>, transform_indices = @transform_1, window_bounds = array<i64: 64, 192>}, {pipeline_mode = #tpu.pipeline_mode<synchronous>, transform_indices = @transform_2, window_bounds = array<i64: 64, 64>}, {pipeline_mode = #tpu.pipeline_mode<synchronous>, transform_indices = @transform_3, window_bounds = array<i64: 64, 256>}, {pipeline_mode = #tpu.pipeline_mode<synchronous>, transform_indices = @transform_4, window_bounds = array<i64: 256, 64>}, {pipeline_mode = #tpu.pipeline_mode<synchronous>, transform_indices = @transform_5, window_bounds = array<i64: 16, 64>}, {pipeline_mode = #tpu.pipeline_mode<synchronous>, transform_indices = @transform_6, window_bounds = array<i64: 1, 256>}, {transform_indices = @transform_7, window_bounds = array<i64: 16, 64>}]} {
    %c0 = arith.constant 0 : index
    %c0_0 = arith.constant 0 : index
    %0 = vector.load %arg1[%c0, %c0_0] : memref<16x64xf32, #tpu.memory_space<vmem>>, vector<16x64xf32>
    %c0_1 = arith.constant 0 : index
    %c0_2 = arith.constant 0 : index
    %1 = vector.load %arg6[%c0_1, %c0_2] : memref<16x64xf32, #tpu.memory_space<vmem>>, vector<16x64xf32>
    %2 = vector.extract_strided_slice %1 {offsets = [0, 0], sizes = [1, 64], strides = [1, 1]} : vector<16x64xf32> to vector<1x64xf32>
    %3 = vector.extract_strided_slice %1 {offsets = [1, 0], sizes = [1, 64], strides = [1, 1]} : vector<16x64xf32> to vector<1x64xf32>
    %4 = vector.extract_strided_slice %1 {offsets = [2, 0], sizes = [1, 64], strides = [1, 1]} : vector<16x64xf32> to vector<1x64xf32>
    %5 = vector.extract_strided_slice %1 {offsets = [3, 0], sizes = [1, 64], strides = [1, 1]} : vector<16x64xf32> to vector<1x64xf32>
    %6 = vector.extract_strided_slice %1 {offsets = [4, 0], sizes = [1, 64], strides = [1, 1]} : vector<16x64xf32> to vector<1x64xf32>
    %7 = vector.extract_strided_slice %1 {offsets = [5, 0], sizes = [1, 64], strides = [1, 1]} : vector<16x64xf32> to vector<1x64xf32>
    %8 = vector.extract_strided_slice %1 {offsets = [6, 0], sizes = [1, 64], strides = [1, 1]} : vector<16x64xf32> to vector<1x64xf32>
    %9 = vector.extract_strided_slice %1 {offsets = [7, 0], sizes = [1, 64], strides = [1, 1]} : vector<16x64xf32> to vector<1x64xf32>
    %10 = vector.extract_strided_slice %1 {offsets = [8, 0], sizes = [1, 64], strides = [1, 1]} : vector<16x64xf32> to vector<1x64xf32>
    %c0_3 = arith.constant 0 : index
    %c0_4 = arith.constant 0 : index
    %11 = vector.load %arg7[%c0_3, %c0_4] : memref<1x256xf32, #tpu.memory_space<vmem>>, vector<1x256xf32>
    %cst = arith.constant dense<0.000000e+00> : vector<16xf32>
    %12 = vector.multi_reduction <add>, %0, %cst [1] : vector<16x64xf32> to vector<16xf32>
    %13 = vector.shape_cast %12 : vector<16xf32> to vector<16x1xf32>
    %cst_5 = arith.constant 6.400000e+01 : f32
    %14 = vector.broadcast %cst_5 : f32 to vector<16x1xf32>
    %15 = arith.divf %13, %14 : vector<16x1xf32>
    %16 = vector.broadcast %15 : vector<16x1xf32> to vector<16x64xf32>
    %17 = arith.subf %0, %16 : vector<16x64xf32>
    %18 = arith.mulf %17, %17 : vector<16x64xf32>
    %cst_6 = arith.constant dense<0.000000e+00> : vector<16xf32>
    %19 = vector.multi_reduction <add>, %18, %cst_6 [1] : vector<16x64xf32> to vector<16xf32>
    %20 = vector.shape_cast %19 : vector<16xf32> to vector<16x1xf32>
    %cst_7 = arith.constant 6.400000e+01 : f32
    %21 = vector.broadcast %cst_7 : f32 to vector<16x1xf32>
    %22 = arith.divf %20, %21 : vector<16x1xf32>
    %23 = vector.broadcast %15 : vector<16x1xf32> to vector<16x64xf32>
    %24 = arith.subf %0, %23 : vector<16x64xf32>
    %cst_8 = arith.constant 9.99999974E-6 : f32
    %25 = vector.broadcast %cst_8 : f32 to vector<16x1xf32>
    %26 = arith.addf %22, %25 : vector<16x1xf32>
    %27 = math.rsqrt %26 : vector<16x1xf32>
    %28 = vector.broadcast %27 : vector<16x1xf32> to vector<16x64xf32>
    %29 = arith.mulf %24, %28 : vector<16x64xf32>
    %30 = vector.broadcast %2 : vector<1x64xf32> to vector<16x64xf32>
    %31 = arith.mulf %29, %30 : vector<16x64xf32>
    %32 = vector.broadcast %3 : vector<1x64xf32> to vector<16x64xf32>
    %33 = arith.addf %31, %32 : vector<16x64xf32>
    %34 = arith.truncf %33 : vector<16x64xf32> to vector<16x64xbf16>
    %c0_9 = arith.constant 0 : index
    %c0_10 = arith.constant 0 : index
    %35 = vector.load %arg2[%c0_9, %c0_10] : memref<64x192xf32, #tpu.memory_space<vmem>>, vector<64x192xf32>
    %36 = arith.truncf %35 : vector<64x192xf32> to vector<64x192xbf16>
    %cst_11 = arith.constant dense<0.000000e+00> : vector<16x192xf32>
    %37 = tpu.matmul %34, %36, %cst_11 {dimension_numbers = #tpu.dot_dimension_numbers<[1], [0], [0], [1], [0, 0, 1, 1], [], []>} : vector<16x64xbf16>, vector<64x192xbf16>, vector<16x192xf32> -> vector<16x192xf32>
    %38 = vector.extract_strided_slice %37 {offsets = [0, 0], sizes = [16, 64], strides = [1, 1]} : vector<16x192xf32> to vector<16x64xf32>
    %39 = vector.broadcast %6 : vector<1x64xf32> to vector<16x64xf32>
    %40 = arith.addf %38, %39 : vector<16x64xf32>
    %cst_12 = arith.constant 2.500000e-01 : f32
    %41 = vector.broadcast %cst_12 : f32 to vector<16x64xf32>
    %42 = arith.mulf %40, %41 : vector<16x64xf32>
    %43 = vector.extract_strided_slice %37 {offsets = [0, 64], sizes = [16, 64], strides = [1, 1]} : vector<16x192xf32> to vector<16x64xf32>
    %44 = vector.broadcast %7 : vector<1x64xf32> to vector<16x64xf32>
    %45 = arith.addf %43, %44 : vector<16x64xf32>
    %46 = vector.extract_strided_slice %37 {offsets = [0, 128], sizes = [16, 64], strides = [1, 1]} : vector<16x192xf32> to vector<16x64xf32>
    %47 = vector.broadcast %8 : vector<1x64xf32> to vector<16x64xf32>
    %48 = arith.addf %46, %47 : vector<16x64xf32>
    %49 = tpu.iota {dimensions = array<i32: 0>} : vector<8x8xi32>
    %50 = tpu.iota {dimensions = array<i32: 1>} : vector<8x8xi32>
    %51 = arith.cmpi sge, %49, %50 : vector<8x8xi32>
    %cst_13 = arith.constant 0.000000e+00 : f32
    %cst_14 = arith.constant -1.000000e+30 : f32
    %52 = vector.broadcast %cst_13 : f32 to vector<8x8xf32>
    %53 = vector.broadcast %cst_14 : f32 to vector<8x8xf32>
    %54 = arith.select %51, %52, %53 : vector<8x8xi1>, vector<8x8xf32>
    %c0_15 = arith.constant 0 : index
    %c0_16 = arith.constant 0 : index
    %55 = vector.load %arg3[%c0_15, %c0_16] : memref<64x64xf32, #tpu.memory_space<vmem>>, vector<64x64xf32>
    %56 = arith.truncf %55 : vector<64x64xf32> to vector<64x64xbf16>
    %cst_17 = arith.constant 0.000000e+00 : f32
    %57 = vector.broadcast %cst_17 : f32 to vector<16x64xf32>
    %58 = vector.extract_strided_slice %42 {offsets = [0, 0], sizes = [16, 16], strides = [1, 1]} : vector<16x64xf32> to vector<16x16xf32>
    %59 = vector.shape_cast %58 : vector<16x16xf32> to vector<2x8x16xf32>
    %60 = arith.truncf %59 : vector<2x8x16xf32> to vector<2x8x16xbf16>
    %61 = vector.extract_strided_slice %45 {offsets = [0, 0], sizes = [16, 16], strides = [1, 1]} : vector<16x64xf32> to vector<16x16xf32>
    %62 = vector.shape_cast %61 : vector<16x16xf32> to vector<2x8x16xf32>
    %63 = arith.truncf %62 : vector<2x8x16xf32> to vector<2x8x16xbf16>
    %64 = vector.extract_strided_slice %48 {offsets = [0, 0], sizes = [16, 16], strides = [1, 1]} : vector<16x64xf32> to vector<16x16xf32>
    %65 = vector.shape_cast %64 : vector<16x16xf32> to vector<2x8x16xf32>
    %66 = arith.truncf %65 : vector<2x8x16xf32> to vector<2x8x16xbf16>
    "tpu.trace_start"() <{level = 10 : i32, message = "bqd,bkd->bqk"}> : () -> ()
    %cst_18 = arith.constant dense<0.000000e+00> : vector<2x8x8xf32>
    %67 = tpu.matmul %60, %63, %cst_18 {dimension_numbers = #tpu.dot_dimension_numbers<[2], [2], [1], [1], [0, 0, 0, 1, 1, 1], [0], [0]>} : vector<2x8x16xbf16>, vector<2x8x16xbf16>, vector<2x8x8xf32> -> vector<2x8x8xf32>
    "tpu.trace_stop"() : () -> ()
    %68 = vector.shape_cast %54 : vector<8x8xf32> to vector<1x8x8xf32>
    %69 = vector.broadcast %68 : vector<1x8x8xf32> to vector<2x8x8xf32>
    %70 = arith.addf %67, %69 : vector<2x8x8xf32>
    %cst_19 = arith.constant dense<0xFF800000> : vector<2x8xf32>
    %71 = vector.multi_reduction <maximumf>, %70, %cst_19 [2] : vector<2x8x8xf32> to vector<2x8xf32>
    %72 = vector.shape_cast %71 : vector<2x8xf32> to vector<2x8x1xf32>
    %73 = vector.broadcast %72 : vector<2x8x1xf32> to vector<2x8x8xf32>
    %74 = arith.subf %70, %73 : vector<2x8x8xf32>
    %75 = math.exp %74 : vector<2x8x8xf32>
    %cst_20 = arith.constant dense<0.000000e+00> : vector<2x8xf32>
    %76 = vector.multi_reduction <add>, %75, %cst_20 [2] : vector<2x8x8xf32> to vector<2x8xf32>
    %77 = vector.shape_cast %76 : vector<2x8xf32> to vector<2x8x1xf32>
    %78 = tpu.reciprocal %77 {approx = true} : vector<2x8x1xf32> -> vector<2x8x1xf32>
    %79 = vector.broadcast %78 : vector<2x8x1xf32> to vector<2x8x8xf32>
    %80 = arith.mulf %75, %79 : vector<2x8x8xf32>
    %81 = arith.truncf %80 : vector<2x8x8xf32> to vector<2x8x8xbf16>
    "tpu.trace_start"() <{level = 10 : i32, message = "bqk,bkd->bqd"}> : () -> ()
    %cst_21 = arith.constant dense<0.000000e+00> : vector<2x8x16xf32>
    %82 = tpu.matmul %81, %66, %cst_21 {dimension_numbers = #tpu.dot_dimension_numbers<[2], [1], [1], [2], [0, 0, 0, 1, 1, 2], [0], [0]>} : vector<2x8x8xbf16>, vector<2x8x16xbf16>, vector<2x8x16xf32> -> vector<2x8x16xf32>
    "tpu.trace_stop"() : () -> ()
    %83 = vector.shape_cast %82 : vector<2x8x16xf32> to vector<16x16xf32>
    %84 = arith.truncf %83 : vector<16x16xf32> to vector<16x16xbf16>
    %85 = vector.extract_strided_slice %56 {offsets = [0, 0], sizes = [16, 64], strides = [1, 1]} : vector<64x64xbf16> to vector<16x64xbf16>
    %cst_22 = arith.constant dense<0.000000e+00> : vector<16x64xf32>
    %86 = tpu.matmul %84, %85, %cst_22 {dimension_numbers = #tpu.dot_dimension_numbers<[1], [0], [0], [1], [0, 0, 1, 1], [], []>} : vector<16x16xbf16>, vector<16x64xbf16>, vector<16x64xf32> -> vector<16x64xf32>
    %87 = arith.addf %57, %86 : vector<16x64xf32>
    %88 = vector.extract_strided_slice %42 {offsets = [0, 16], sizes = [16, 16], strides = [1, 1]} : vector<16x64xf32> to vector<16x16xf32>
    %89 = vector.shape_cast %88 : vector<16x16xf32> to vector<2x8x16xf32>
    %90 = arith.truncf %89 : vector<2x8x16xf32> to vector<2x8x16xbf16>
    %91 = vector.extract_strided_slice %45 {offsets = [0, 16], sizes = [16, 16], strides = [1, 1]} : vector<16x64xf32> to vector<16x16xf32>
    %92 = vector.shape_cast %91 : vector<16x16xf32> to vector<2x8x16xf32>
    %93 = arith.truncf %92 : vector<2x8x16xf32> to vector<2x8x16xbf16>
    %94 = vector.extract_strided_slice %48 {offsets = [0, 16], sizes = [16, 16], strides = [1, 1]} : vector<16x64xf32> to vector<16x16xf32>
    %95 = vector.shape_cast %94 : vector<16x16xf32> to vector<2x8x16xf32>
    %96 = arith.truncf %95 : vector<2x8x16xf32> to vector<2x8x16xbf16>
    "tpu.trace_start"() <{level = 10 : i32, message = "bqd,bkd->bqk"}> : () -> ()
    %cst_23 = arith.constant dense<0.000000e+00> : vector<2x8x8xf32>
    %97 = tpu.matmul %90, %93, %cst_23 {dimension_numbers = #tpu.dot_dimension_numbers<[2], [2], [1], [1], [0, 0, 0, 1, 1, 1], [0], [0]>} : vector<2x8x16xbf16>, vector<2x8x16xbf16>, vector<2x8x8xf32> -> vector<2x8x8xf32>
    "tpu.trace_stop"() : () -> ()
    %98 = vector.shape_cast %54 : vector<8x8xf32> to vector<1x8x8xf32>
    %99 = vector.broadcast %98 : vector<1x8x8xf32> to vector<2x8x8xf32>
    %100 = arith.addf %97, %99 : vector<2x8x8xf32>
    %cst_24 = arith.constant dense<0xFF800000> : vector<2x8xf32>
    %101 = vector.multi_reduction <maximumf>, %100, %cst_24 [2] : vector<2x8x8xf32> to vector<2x8xf32>
    %102 = vector.shape_cast %101 : vector<2x8xf32> to vector<2x8x1xf32>
    %103 = vector.broadcast %102 : vector<2x8x1xf32> to vector<2x8x8xf32>
    %104 = arith.subf %100, %103 : vector<2x8x8xf32>
    %105 = math.exp %104 : vector<2x8x8xf32>
    %cst_25 = arith.constant dense<0.000000e+00> : vector<2x8xf32>
    %106 = vector.multi_reduction <add>, %105, %cst_25 [2] : vector<2x8x8xf32> to vector<2x8xf32>
    %107 = vector.shape_cast %106 : vector<2x8xf32> to vector<2x8x1xf32>
    %108 = tpu.reciprocal %107 {approx = true} : vector<2x8x1xf32> -> vector<2x8x1xf32>
    %109 = vector.broadcast %108 : vector<2x8x1xf32> to vector<2x8x8xf32>
    %110 = arith.mulf %105, %109 : vector<2x8x8xf32>
    %111 = arith.truncf %110 : vector<2x8x8xf32> to vector<2x8x8xbf16>
    "tpu.trace_start"() <{level = 10 : i32, message = "bqk,bkd->bqd"}> : () -> ()
    %cst_26 = arith.constant dense<0.000000e+00> : vector<2x8x16xf32>
    %112 = tpu.matmul %111, %96, %cst_26 {dimension_numbers = #tpu.dot_dimension_numbers<[2], [1], [1], [2], [0, 0, 0, 1, 1, 2], [0], [0]>} : vector<2x8x8xbf16>, vector<2x8x16xbf16>, vector<2x8x16xf32> -> vector<2x8x16xf32>
    "tpu.trace_stop"() : () -> ()
    %113 = vector.shape_cast %112 : vector<2x8x16xf32> to vector<16x16xf32>
    %114 = arith.truncf %113 : vector<16x16xf32> to vector<16x16xbf16>
    %115 = vector.extract_strided_slice %56 {offsets = [16, 0], sizes = [16, 64], strides = [1, 1]} : vector<64x64xbf16> to vector<16x64xbf16>
    %cst_27 = arith.constant dense<0.000000e+00> : vector<16x64xf32>
    %116 = tpu.matmul %114, %115, %cst_27 {dimension_numbers = #tpu.dot_dimension_numbers<[1], [0], [0], [1], [0, 0, 1, 1], [], []>} : vector<16x16xbf16>, vector<16x64xbf16>, vector<16x64xf32> -> vector<16x64xf32>
    %117 = arith.addf %87, %116 : vector<16x64xf32>
    %118 = vector.extract_strided_slice %42 {offsets = [0, 32], sizes = [16, 16], strides = [1, 1]} : vector<16x64xf32> to vector<16x16xf32>
    %119 = vector.shape_cast %118 : vector<16x16xf32> to vector<2x8x16xf32>
    %120 = arith.truncf %119 : vector<2x8x16xf32> to vector<2x8x16xbf16>
    %121 = vector.extract_strided_slice %45 {offsets = [0, 32], sizes = [16, 16], strides = [1, 1]} : vector<16x64xf32> to vector<16x16xf32>
    %122 = vector.shape_cast %121 : vector<16x16xf32> to vector<2x8x16xf32>
    %123 = arith.truncf %122 : vector<2x8x16xf32> to vector<2x8x16xbf16>
    %124 = vector.extract_strided_slice %48 {offsets = [0, 32], sizes = [16, 16], strides = [1, 1]} : vector<16x64xf32> to vector<16x16xf32>
    %125 = vector.shape_cast %124 : vector<16x16xf32> to vector<2x8x16xf32>
    %126 = arith.truncf %125 : vector<2x8x16xf32> to vector<2x8x16xbf16>
    "tpu.trace_start"() <{level = 10 : i32, message = "bqd,bkd->bqk"}> : () -> ()
    %cst_28 = arith.constant dense<0.000000e+00> : vector<2x8x8xf32>
    %127 = tpu.matmul %120, %123, %cst_28 {dimension_numbers = #tpu.dot_dimension_numbers<[2], [2], [1], [1], [0, 0, 0, 1, 1, 1], [0], [0]>} : vector<2x8x16xbf16>, vector<2x8x16xbf16>, vector<2x8x8xf32> -> vector<2x8x8xf32>
    "tpu.trace_stop"() : () -> ()
    %128 = vector.shape_cast %54 : vector<8x8xf32> to vector<1x8x8xf32>
    %129 = vector.broadcast %128 : vector<1x8x8xf32> to vector<2x8x8xf32>
    %130 = arith.addf %127, %129 : vector<2x8x8xf32>
    %cst_29 = arith.constant dense<0xFF800000> : vector<2x8xf32>
    %131 = vector.multi_reduction <maximumf>, %130, %cst_29 [2] : vector<2x8x8xf32> to vector<2x8xf32>
    %132 = vector.shape_cast %131 : vector<2x8xf32> to vector<2x8x1xf32>
    %133 = vector.broadcast %132 : vector<2x8x1xf32> to vector<2x8x8xf32>
    %134 = arith.subf %130, %133 : vector<2x8x8xf32>
    %135 = math.exp %134 : vector<2x8x8xf32>
    %cst_30 = arith.constant dense<0.000000e+00> : vector<2x8xf32>
    %136 = vector.multi_reduction <add>, %135, %cst_30 [2] : vector<2x8x8xf32> to vector<2x8xf32>
    %137 = vector.shape_cast %136 : vector<2x8xf32> to vector<2x8x1xf32>
    %138 = tpu.reciprocal %137 {approx = true} : vector<2x8x1xf32> -> vector<2x8x1xf32>
    %139 = vector.broadcast %138 : vector<2x8x1xf32> to vector<2x8x8xf32>
    %140 = arith.mulf %135, %139 : vector<2x8x8xf32>
    %141 = arith.truncf %140 : vector<2x8x8xf32> to vector<2x8x8xbf16>
    "tpu.trace_start"() <{level = 10 : i32, message = "bqk,bkd->bqd"}> : () -> ()
    %cst_31 = arith.constant dense<0.000000e+00> : vector<2x8x16xf32>
    %142 = tpu.matmul %141, %126, %cst_31 {dimension_numbers = #tpu.dot_dimension_numbers<[2], [1], [1], [2], [0, 0, 0, 1, 1, 2], [0], [0]>} : vector<2x8x8xbf16>, vector<2x8x16xbf16>, vector<2x8x16xf32> -> vector<2x8x16xf32>
    "tpu.trace_stop"() : () -> ()
    %143 = vector.shape_cast %142 : vector<2x8x16xf32> to vector<16x16xf32>
    %144 = arith.truncf %143 : vector<16x16xf32> to vector<16x16xbf16>
    %145 = vector.extract_strided_slice %56 {offsets = [32, 0], sizes = [16, 64], strides = [1, 1]} : vector<64x64xbf16> to vector<16x64xbf16>
    %cst_32 = arith.constant dense<0.000000e+00> : vector<16x64xf32>
    %146 = tpu.matmul %144, %145, %cst_32 {dimension_numbers = #tpu.dot_dimension_numbers<[1], [0], [0], [1], [0, 0, 1, 1], [], []>} : vector<16x16xbf16>, vector<16x64xbf16>, vector<16x64xf32> -> vector<16x64xf32>
    %147 = arith.addf %117, %146 : vector<16x64xf32>
    %148 = vector.extract_strided_slice %42 {offsets = [0, 48], sizes = [16, 16], strides = [1, 1]} : vector<16x64xf32> to vector<16x16xf32>
    %149 = vector.shape_cast %148 : vector<16x16xf32> to vector<2x8x16xf32>
    %150 = arith.truncf %149 : vector<2x8x16xf32> to vector<2x8x16xbf16>
    %151 = vector.extract_strided_slice %45 {offsets = [0, 48], sizes = [16, 16], strides = [1, 1]} : vector<16x64xf32> to vector<16x16xf32>
    %152 = vector.shape_cast %151 : vector<16x16xf32> to vector<2x8x16xf32>
    %153 = arith.truncf %152 : vector<2x8x16xf32> to vector<2x8x16xbf16>
    %154 = vector.extract_strided_slice %48 {offsets = [0, 48], sizes = [16, 16], strides = [1, 1]} : vector<16x64xf32> to vector<16x16xf32>
    %155 = vector.shape_cast %154 : vector<16x16xf32> to vector<2x8x16xf32>
    %156 = arith.truncf %155 : vector<2x8x16xf32> to vector<2x8x16xbf16>
    "tpu.trace_start"() <{level = 10 : i32, message = "bqd,bkd->bqk"}> : () -> ()
    %cst_33 = arith.constant dense<0.000000e+00> : vector<2x8x8xf32>
    %157 = tpu.matmul %150, %153, %cst_33 {dimension_numbers = #tpu.dot_dimension_numbers<[2], [2], [1], [1], [0, 0, 0, 1, 1, 1], [0], [0]>} : vector<2x8x16xbf16>, vector<2x8x16xbf16>, vector<2x8x8xf32> -> vector<2x8x8xf32>
    "tpu.trace_stop"() : () -> ()
    %158 = vector.shape_cast %54 : vector<8x8xf32> to vector<1x8x8xf32>
    %159 = vector.broadcast %158 : vector<1x8x8xf32> to vector<2x8x8xf32>
    %160 = arith.addf %157, %159 : vector<2x8x8xf32>
    %cst_34 = arith.constant dense<0xFF800000> : vector<2x8xf32>
    %161 = vector.multi_reduction <maximumf>, %160, %cst_34 [2] : vector<2x8x8xf32> to vector<2x8xf32>
    %162 = vector.shape_cast %161 : vector<2x8xf32> to vector<2x8x1xf32>
    %163 = vector.broadcast %162 : vector<2x8x1xf32> to vector<2x8x8xf32>
    %164 = arith.subf %160, %163 : vector<2x8x8xf32>
    %165 = math.exp %164 : vector<2x8x8xf32>
    %cst_35 = arith.constant dense<0.000000e+00> : vector<2x8xf32>
    %166 = vector.multi_reduction <add>, %165, %cst_35 [2] : vector<2x8x8xf32> to vector<2x8xf32>
    %167 = vector.shape_cast %166 : vector<2x8xf32> to vector<2x8x1xf32>
    %168 = tpu.reciprocal %167 {approx = true} : vector<2x8x1xf32> -> vector<2x8x1xf32>
    %169 = vector.broadcast %168 : vector<2x8x1xf32> to vector<2x8x8xf32>
    %170 = arith.mulf %165, %169 : vector<2x8x8xf32>
    %171 = arith.truncf %170 : vector<2x8x8xf32> to vector<2x8x8xbf16>
    "tpu.trace_start"() <{level = 10 : i32, message = "bqk,bkd->bqd"}> : () -> ()
    %cst_36 = arith.constant dense<0.000000e+00> : vector<2x8x16xf32>
    %172 = tpu.matmul %171, %156, %cst_36 {dimension_numbers = #tpu.dot_dimension_numbers<[2], [1], [1], [2], [0, 0, 0, 1, 1, 2], [0], [0]>} : vector<2x8x8xbf16>, vector<2x8x16xbf16>, vector<2x8x16xf32> -> vector<2x8x16xf32>
    "tpu.trace_stop"() : () -> ()
    %173 = vector.shape_cast %172 : vector<2x8x16xf32> to vector<16x16xf32>
    %174 = arith.truncf %173 : vector<16x16xf32> to vector<16x16xbf16>
    %175 = vector.extract_strided_slice %56 {offsets = [48, 0], sizes = [16, 64], strides = [1, 1]} : vector<64x64xbf16> to vector<16x64xbf16>
    %cst_37 = arith.constant dense<0.000000e+00> : vector<16x64xf32>
    %176 = tpu.matmul %174, %175, %cst_37 {dimension_numbers = #tpu.dot_dimension_numbers<[1], [0], [0], [1], [0, 0, 1, 1], [], []>} : vector<16x16xbf16>, vector<16x64xbf16>, vector<16x64xf32> -> vector<16x64xf32>
    %177 = arith.addf %147, %176 : vector<16x64xf32>
    %178 = arith.addf %0, %177 : vector<16x64xf32>
    %179 = vector.broadcast %9 : vector<1x64xf32> to vector<16x64xf32>
    %180 = arith.addf %178, %179 : vector<16x64xf32>
    %cst_38 = arith.constant dense<0.000000e+00> : vector<16xf32>
    %181 = vector.multi_reduction <add>, %180, %cst_38 [1] : vector<16x64xf32> to vector<16xf32>
    %182 = vector.shape_cast %181 : vector<16xf32> to vector<16x1xf32>
    %cst_39 = arith.constant 6.400000e+01 : f32
    %183 = vector.broadcast %cst_39 : f32 to vector<16x1xf32>
    %184 = arith.divf %182, %183 : vector<16x1xf32>
    %185 = vector.broadcast %184 : vector<16x1xf32> to vector<16x64xf32>
    %186 = arith.subf %180, %185 : vector<16x64xf32>
    %187 = arith.mulf %186, %186 : vector<16x64xf32>
    %cst_40 = arith.constant dense<0.000000e+00> : vector<16xf32>
    %188 = vector.multi_reduction <add>, %187, %cst_40 [1] : vector<16x64xf32> to vector<16xf32>
    %189 = vector.shape_cast %188 : vector<16xf32> to vector<16x1xf32>
    %cst_41 = arith.constant 6.400000e+01 : f32
    %190 = vector.broadcast %cst_41 : f32 to vector<16x1xf32>
    %191 = arith.divf %189, %190 : vector<16x1xf32>
    %192 = vector.broadcast %184 : vector<16x1xf32> to vector<16x64xf32>
    %193 = arith.subf %180, %192 : vector<16x64xf32>
    %cst_42 = arith.constant 9.99999974E-6 : f32
    %194 = vector.broadcast %cst_42 : f32 to vector<16x1xf32>
    %195 = arith.addf %191, %194 : vector<16x1xf32>
    %196 = math.rsqrt %195 : vector<16x1xf32>
    %197 = vector.broadcast %196 : vector<16x1xf32> to vector<16x64xf32>
    %198 = arith.mulf %193, %197 : vector<16x64xf32>
    %199 = vector.broadcast %4 : vector<1x64xf32> to vector<16x64xf32>
    %200 = arith.mulf %198, %199 : vector<16x64xf32>
    %201 = vector.broadcast %5 : vector<1x64xf32> to vector<16x64xf32>
    %202 = arith.addf %200, %201 : vector<16x64xf32>
    %203 = arith.truncf %202 : vector<16x64xf32> to vector<16x64xbf16>
    %c0_43 = arith.constant 0 : index
    %c0_44 = arith.constant 0 : index
    %204 = vector.load %arg4[%c0_43, %c0_44] : memref<64x256xf32, #tpu.memory_space<vmem>>, vector<64x256xf32>
    %205 = arith.truncf %204 : vector<64x256xf32> to vector<64x256xbf16>
    %cst_45 = arith.constant dense<0.000000e+00> : vector<16x256xf32>
    %206 = tpu.matmul %203, %205, %cst_45 {dimension_numbers = #tpu.dot_dimension_numbers<[1], [0], [0], [1], [0, 0, 1, 1], [], []>} : vector<16x64xbf16>, vector<64x256xbf16>, vector<16x256xf32> -> vector<16x256xf32>
    %207 = vector.broadcast %11 : vector<1x256xf32> to vector<16x256xf32>
    %208 = arith.addf %206, %207 : vector<16x256xf32>
    %cst_46 = arith.constant 0.000000e+00 : f32
    %209 = vector.broadcast %cst_46 : f32 to vector<16x256xf32>
    %210 = arith.maximumf %208, %209 : vector<16x256xf32>
    %211 = arith.truncf %210 : vector<16x256xf32> to vector<16x256xbf16>
    %c0_47 = arith.constant 0 : index
    %c0_48 = arith.constant 0 : index
    %212 = vector.load %arg5[%c0_47, %c0_48] : memref<256x64xf32, #tpu.memory_space<vmem>>, vector<256x64xf32>
    %213 = arith.truncf %212 : vector<256x64xf32> to vector<256x64xbf16>
    %cst_49 = arith.constant dense<0.000000e+00> : vector<16x64xf32>
    %214 = tpu.matmul %211, %213, %cst_49 {dimension_numbers = #tpu.dot_dimension_numbers<[1], [0], [0], [1], [0, 0, 1, 1], [], []>} : vector<16x256xbf16>, vector<256x64xbf16>, vector<16x64xf32> -> vector<16x64xf32>
    %215 = vector.broadcast %10 : vector<1x64xf32> to vector<16x64xf32>
    %216 = arith.addf %214, %215 : vector<16x64xf32>
    %217 = arith.addf %180, %216 : vector<16x64xf32>
    %c0_50 = arith.constant 0 : index
    %c0_51 = arith.constant 0 : index
    %218 = vector.load %arg8[%c0_50, %c0_51] : memref<16x64xf32, #tpu.memory_space<vmem>>, vector<16x64xf32>
    tpu.vector_store %arg8[%c0_50, %c0_51], %217 {strides = array<i32>} : memref<16x64xf32, #tpu.memory_space<vmem>>, vector<16x64xf32>,
    return
  }
  func.func @transform_0(%arg0: i32) -> (i32, i32) {
    %c0_i32 = arith.constant 0 : i32
    %c0_i32_0 = arith.constant 0 : i32
    return %arg0, %c0_i32 : i32, i32
  }
  func.func @transform_1(%arg0: i32) -> (i32, i32) {
    %c0_i32 = arith.constant 0 : i32
    %c0_i32_0 = arith.constant 0 : i32
    %c0_i32_1 = arith.constant 0 : i32
    return %c0_i32, %c0_i32_0 : i32, i32
  }
  func.func @transform_2(%arg0: i32) -> (i32, i32) {
    %c0_i32 = arith.constant 0 : i32
    %c0_i32_0 = arith.constant 0 : i32
    %c0_i32_1 = arith.constant 0 : i32
    return %c0_i32, %c0_i32_0 : i32, i32
  }
  func.func @transform_3(%arg0: i32) -> (i32, i32) {
    %c0_i32 = arith.constant 0 : i32
    %c0_i32_0 = arith.constant 0 : i32
    %c0_i32_1 = arith.constant 0 : i32
    return %c0_i32, %c0_i32_0 : i32, i32
  }
  func.func @transform_4(%arg0: i32) -> (i32, i32) {
    %c0_i32 = arith.constant 0 : i32
    %c0_i32_0 = arith.constant 0 : i32
    %c0_i32_1 = arith.constant 0 : i32
    return %c0_i32, %c0_i32_0 : i32, i32
  }
  func.func @transform_5(%arg0: i32) -> (i32, i32) {
    %c0_i32 = arith.constant 0 : i32
    %c0_i32_0 = arith.constant 0 : i32
    %c0_i32_1 = arith.constant 0 : i32
    return %c0_i32, %c0_i32_0 : i32, i32
  }
  func.func @transform_6(%arg0: i32) -> (i32, i32) {
    %c0_i32 = arith.constant 0 : i32
    %c0_i32_0 = arith.constant 0 : i32
    %c0_i32_1 = arith.constant 0 : i32
    return %c0_i32, %c0_i32_0 : i32, i32
  }
  func.func @transform_7(%arg0: i32) -> (i32, i32) {
    %c0_i32 = arith.constant 0 : i32
    %c0_i32_0 = arith.constant 0 : i32
    return %arg0, %c0_i32 : i32, i32
  }
}

</mosaic_0001>

<bundles_post_ra>
// kernel: tpu_custom_call.1
= control target key start
LH: loop header
LB: loop body
LE: loop exit
PB: predicated region body
PF: predicated region fallthrough
CT: control target
= control target key end

     0   :  { %vm33_vm0 = vcmask 523264   ;;  %s2344_s0 = inlined_call_operand.vmem [shape: f32[16,64], index: 0, kind: input, shape index: {}]   ;;  %s2345_s1 = inlined_call_operand.vmem [shape: f32[64,192], index: 1, kind: input, shape index: {}]   ;;  %s2346_s2 = inlined_call_operand.vmem [shape: f32[64,64], index: 2, kind: input, shape index: {}]   ;;  %s2347_s3 = inlined_call_operand.vmem [shape: f32[64,256], index: 3, kind: input, shape index: {}]   ;;  %s2348_s4 = inlined_call_operand.vmem [shape: f32[256,64], index: 4, kind: input, shape index: {}]   ;;  %s2349_s5 = inlined_call_operand.vmem [shape: f32[16,64], index: 5, kind: input, shape index: {}]   ;;  %s2350_s6 = inlined_call_operand.vmem [shape: f32[1,256], index: 6, kind: input, shape index: {}]   ;;  %s2351_s7 = inlined_call_operand.hbm [shape: f32[16,64], index: 7, kind: output, shape index: {}]  }
   0x1   :  { %v1842_v0 = vld [vmem:[%s2344_s0] sm:$0xff]  ;;  %v1847_v1 = vld [vmem:[%s2344_s0 + $0x8] sm:$0xff] }
   0x2   :  { %12 = vsyncpa [#allocation3], 0  ;;  %v34_v2 = vsel %vm33_vm0, %v1842_v0, 0.0  ;;  %v37_v3 = vsel %vm33_vm0, %v1847_v1, 0.0  ;;  %v87_v14 = vld [vmem:[%s2345_s1 + $0x68] sm:$0xff]  ;;  %v89_v15 = vld [vmem:[%s2345_s1 + $0x78] sm:$0xff]  ;;  %v61_v39 = vlaneseq }
   0x3   :  { %35 = vadd.xlane.f32.xlu0 %v34_v2  ;;  %v86_v16 = vld [vmem:[%s2345_s1 + $0x60] sm:$0xff]  ;;  %v97_v17 = vpack.c.bf16 %v89_v15, %v87_v14  ;;  %v88_v18 = vld [vmem:[%s2345_s1 + $0x70] sm:$0xff]  ;;  %v83_v19 = vld [vmem:[%s2345_s1 + $0x48] sm:$0xff]  ;;  %v1785_v21 = vmov 0   ;;  %s1786_s14 = smov 64   ;;  %v1787_v63 = vmov 0.0  }
   0x4   :  { %v85_v20 = vld [vmem:[%s2345_s1 + $0x58] sm:$0xff]  ;;  %133 = vmatprep.mubr.bf16.mxu0 %v1785_v21  ;;  %v96_v22 = vpack.c.bf16 %v88_v18, %v86_v16  ;;  %v82_v24 = vld [vmem:[%s2345_s1 + $0x40] sm:$0xff]  ;;  %v84_v25 = vld [vmem:[%s2345_s1 + $0x50] sm:$0xff]  ;;  %v1907_v40 = vshrl.u32 %v61_v39, 7  ;;  %1594 = vmatprep.subr.bf16.mxu1 %v1787_v63  ;;  %vm1788_vm1 = vmmov 0   ;;  %vm195_vm2 = vcmask 130048  }
   0x5   :  { %v95_v23 = vpack.c.bf16 %v85_v20, %v83_v19  ;;  %v79_v26 = vld [vmem:[%s2345_s1 + $0x28] sm:$0xff]  ;;  %109 = vmatprep.subr.bf16.mxu0 %v97_v17  ;;  %v81_v27 = vld [vmem:[%s2345_s1 + $0x38] sm:$0xff]  ;;  %v94_v28 = vpack.c.bf16 %v84_v25, %v82_v24  ;;  %v78_v30 = vld [vmem:[%s2345_s1 + $0x20] sm:$0xff]  ;;  %1596 = vmatprep.mubr.msk.bf16.mxu1 %vm1788_vm1, %v1787_v63  ;;  %vm319_vm3 = vcmask 1043456   ;;  %vm291_vm5 = vcmask 64512   ;;  %s1791_s15 = smov 112  }
   0x6   :  { %110 = vmatpush1.bf16.msra.mxu0 %v96_v22  ;;  %v93_v29 = vpack.c.bf16 %v81_v27, %v79_v26  ;;  %v80_v31 = vld [vmem:[%s2345_s1 + $0x30] sm:$0xff]  ;;  %v75_v32 = vld [vmem:[%s2345_s1 + $0x8] sm:$0xff]  ;;  %v77_v33 = vld [vmem:[%s2345_s1 + $0x18] sm:$0xff]  ;;  %v154_v41 = vsub.s32 5, %v1907_v40  ;;  %v1918_v50 = vsub.s32 0, %v1907_v40  ;;  %v69_v54 = vsub.s32 1, %v1907_v40 }
   0x7   :  { %38 = vadd.xlane.f32.xlu0 %v37_v3  ;;  %111 = vmatprep.subr.bf16.mxu0 %v95_v23  ;;  %v92_v34 = vpack.c.bf16 %v80_v31, %v78_v30  ;;  %v91_v35 = vpack.c.bf16 %v77_v33, %v75_v32  ;;  %v74_v36 = vld [vmem:[%s2345_s1] sm:$0xff]  ;;  %v76_v37 = vld [vmem:[%s2345_s1 + $0x10] sm:$0xff]  ;;  %v171_v32 = vand.u32 127, %v61_v39  ;;  %v1789_v33 = vmov -1e+30   ;;  %s1790_s1 = smov 48  }
   0x8   :  { %v90_v38 = vpack.c.bf16 %v76_v37, %v74_v36  ;;  %v1913_v42 = vld [vmem:[%s2349_s5] sm:$0xff]  ;;  %s1792_s16 = smov 32   ;;  %s1793_s17 = smov 96  }
   0x9   :  { %v155_v43 = vrot.slane %v1913_v42, %v154_v41  ;;  %v64_v53 = vrot.slane %v1913_v42, %v1918_v50  ;;  %v70_v58 = vrot.slane %v1913_v42, %v69_v54  ;;  %vm172_vm4 = vcmp.ge.s32.totalorder %v1907_v40, %v171_v32  ;;  %s1794_s26 = smov 16   ;;  %s1795_s27 = smov 80  }
   0xa   :  { %112 = vmatpush1.bf16.msra.mxu0 %v94_v28  ;;  %s1796_s28 = smov [#allocation2]  }
   0xb   :  { %113 = vmatprep.subr.bf16.mxu0 %v93_v29  ;;  %s1493_s29 = sshll.u32 %s1796_s28, 4  ;;  %s1494_s29 = int_to_ptr.vmem [resolvable:$true] %s1493_s29 }
   0xc   :  { %p1768_p1 = scmp.lt.s32.totalorder %s1494_s29, %s1494_s29 }
   0xe   :  { %114 = vmatpush1.bf16.msra.mxu0 %v92_v34  ;;  %v1973_v34 = vsel %vm172_vm4, 0.0, %v1789_v33 }
   0xf   :  { %115 = vmatprep.subr.bf16.mxu0 %v91_v35 }
  0x12   :  { %116 = vmatpush1.bf16.msra.mxu0 %v90_v38 }
  0x13   :  { %1588 = vmatprep.subr.bf16.mxu0 %v1787_v63 }
  0x1d   :  { %157 = vrot.lane.b32.xlu0 %v155_v43, %s1786_s14 }
  0x8c   :  { %v36_v4 = vpop.xlane.xlu0 %35 }
  0x8d   :  { %v41_v5 = vmul.f32 0.015625, %v36_v4 }
  0x8f   :  { %v43_v6 = vsub.f32 %v1842_v0, %v41_v5 }
  0x90   :  { %v39_v7 = vpop.xlane.xlu0 %38 }
  0x91   :  { %v42_v8 = vmul.f32 0.015625, %v39_v7  ;;  %v45_v9 = vmul.f32 %v43_v6, %v43_v6 }
  0x93   :  { %v44_v10 = vsub.f32 %v1847_v1, %v42_v8  ;;  %v47_v11 = vsel %vm33_vm0, %v45_v9, 0.0 }
  0x94   :  { %48 = vadd.xlane.f32.xlu1 %v47_v11  ;;  %v158_v2 = vpop.permute.xlu0 %157  ;;  %v164_v11 = vsub.s32 6, %v1907_v40 }
  0x95   :  { %v46_v12 = vmul.f32 %v44_v10, %v44_v10 }
  0x97   :  { %v50_v13 = vsel %vm33_vm0, %v46_v12, 0.0 }
  0x98   :  { %51 = vadd.xlane.f32.xlu1 %v50_v13  ;;  %v165_v13 = vrot.slane %v1913_v42, %v164_v11 }
 0x11d   :  { %v49_v44 = vpop.xlane.xlu1 %48 }
 0x11e   :  { %v53_v45 = vmul.f32 0.015625, %v49_v44 }
 0x120   :  { %v55_v46 = vadd.f32 1e-05, %v53_v45 }
 0x121   :  { %v52_v47 = vpop.xlane.xlu1 %51 }
 0x122   :  { %1722 = vrsqrt.f32 %v55_v46  ;;  %v54_v48 = vmul.f32 0.015625, %v52_v47 }
 0x124   :  { %v56_v49 = vadd.f32 1e-05, %v54_v48 }
 0x126   :  { %1724 = vrsqrt.f32 %v56_v49 }
 0x12f   :  { %v1723_v51 = vpop.eup %1722 }
 0x130   :  { %v59_v52 = vmul.f32 %v1723_v51, %v43_v6 }
 0x132   :  { %v65_v57 = vmul.f32 %v64_v53, %v59_v52 }
 0x133   :  { %v1725_v55 = vpop.eup %1724 }
 0x134   :  { %v60_v56 = vmul.f32 %v1725_v55, %v44_v10  ;;  %v71_v60 = vadd.f32 %v70_v58, %v65_v57  ;;  %v146_v10 = vsub.s32 4, %v1907_v40 }
 0x136   :  { %v66_v59 = vmul.f32 %v64_v53, %v60_v56  ;;  %v147_v12 = vrot.slane %v1913_v42, %v146_v10 }
 0x138   :  { %v72_v61 = vadd.f32 %v70_v58, %v66_v59 }
 0x13a   :  { %v73_v62 = vpack.c.bf16 %v72_v61, %v71_v60 }
 0x13c   :  { %1504 = vmatmul.mubr.msk.bf16.vlgmr.msra.gmra.mxu0 %vm33_vm0, %v73_v62 }
 0x13d   :  { %1590 = vmatprep.mubr.msk.bf16.mxu0 %vm1788_vm1, %v1787_v63 }
 0x1fc   :  { %v135_v3 = vpop.f32.mrf.mxu0 }
 0x1fd   :  { %v160_v4 = vadd.f32 %v158_v2, %v135_v3  ;;  %v148_v14 = vadd.f32 %v147_v12, %v135_v3 }
 0x1fe   :  { %v137_v5 = vpop.f32.mrf.mxu0 }
 0x1ff   :  { %v1933_v6 = vpack.c.bf16 %v160_v4, %v160_v4  ;;  %v166_v16 = vadd.f32 %v165_v13, %v137_v5  ;;  %v150_v19 = vmul.f32 0.25, %v148_v14 }
 0x200   :  { %v139_v7 = vpop.f32.mrf.mxu0 }
 0x201   :  { %v161_v8 = vadd.f32 %v158_v2, %v139_v7  ;;  %193 = vrot.lane.b32.xlu1 %v1933_v6, %s1786_s14  ;;  %v149_v20 = vadd.f32 %v147_v12, %v139_v7  ;;  %v1947_v23 = vpack.c.bf16 %v166_v16, %v166_v16  ;;  %v1950_v26 = vpack.c.bf16 %v150_v19, %v150_v19 }
 0x202   :  { %v141_v18 = vpop.f32.mrf.mxu0 }
 0x203   :  { %v1937_v9 = vpack.c.bf16 %v161_v8, %v161_v8  ;;  %v167_v24 = vadd.f32 %v165_v13, %v141_v18  ;;  %v151_v27 = vmul.f32 0.25, %v149_v20  ;;  %v321_v29 = vsel %vm319_vm3, %v1947_v23, 0 }
 0x205   :  { %243 = vrot.lane.b32.xlu1 %v1937_v9, %s1786_s14  ;;  %v1953_v28 = vpack.c.bf16 %v167_v24, %v167_v24  ;;  %v1961_v30 = vpack.c.bf16 %v151_v27, %v151_v27 }
 0x207   :  { %v367_v31 = vsel %vm319_vm3, %v1953_v28, 0 }
 0x273   :  { %v194_v15 = vpop.permute.xlu1 %193 }
 0x274   :  { %v200_v17 = vsel %vm195_vm2, %v194_v15, 0 }
 0x275   :  { %1589 = vmatpush3.bf16.xpose.msra.mxu0 %v200_v17 }
 0x276   :  { %1600 = vmatprep.subr.bf16.mxu0 %v1787_v63 }
 0x277   :  { %v244_v22 = vpop.permute.xlu1 %243 }
 0x278   :  { %v249_v25 = vsel %vm195_vm2, %v244_v22, 0 }
 0x279   :  { %1595 = vmatpush3.bf16.xpose.msra.mxu1 %v249_v25 }
 0x27a   :  { %1606 = vmatprep.subr.bf16.mxu1 %v1787_v63 }
 0x27c   :  { %1591 = vmatmul.mubr.msk.bf16.vlgmr.msra.gmra.mxu0 %vm195_vm2, %v1950_v26 }
 0x27d   :  { %1601 = vmatpush3.bf16.msra.mxu0 %v321_v29  ;;  %1602 = vmatprep.mubr.msk.bf16.mxu0 %vm1788_vm1, %v1787_v63 }
 0x27e   :  { %1612 = vmatprep.subr.bf16.mxu0 %v1787_v63 }
 0x280   :  { %1597 = vmatmul.mubr.msk.bf16.vlgmr.msra.gmra.mxu1 %vm195_vm2, %v1961_v30 }
 0x281   :  { %1607 = vmatpush3.bf16.msra.mxu1 %v367_v31  ;;  %1608 = vmatprep.mubr.msk.bf16.mxu1 %vm1788_vm1, %v1787_v63 }
 0x282   :  { %1618 = vmatprep.subr.bf16.mxu1 %v1787_v63 }
 0x33c   :  { %v236_v35 = vpop.f32.mrf.mxu0 }
 0x33d   :  { %v237_v36 = vadd.f32 %v236_v35, %v1973_v34 }
 0x33e   :  { %v1592_v37 = vpop.f32.mrf.mxu0 }
 0x33f   :  { %v292_v38 = vsel %vm291_vm5, %v237_v36, -inf }
 0x340   :  { %293 = vmax.xlane.f32.xlu1 %v292_v38  ;;  %v239_v41 = vpop.f32.mrf.mxu0  ;;  %v285_v43 = vpop.f32.mrf.mxu1 }
 0x341   :  { %v286_v44 = vadd.f32 %v285_v43, %v1973_v34 }
 0x342   :  { %v1593_v45 = vpop.f32.mrf.mxu0  ;;  %v1598_v46 = vpop.f32.mrf.mxu1 }
 0x343   :  { %v295_v39 = vsel %vm291_vm5, %v286_v44, -inf }
 0x344   :  { %296 = vmax.xlane.f32.xlu0 %v295_v39  ;;  %v288_v47 = vpop.f32.mrf.mxu1 }
 0x346   :  { %v1599_v48 = vpop.f32.mrf.mxu1 }
 0x351   :  { %413 = vrot.lane.b32.xlu1 %v1933_v6, %s1790_s1 }
 0x355   :  { %411 = vrot.lane.b32.xlu1 %v1950_v26, %s1791_s15 }
 0x359   :  { %462 = vrot.lane.b32.xlu1 %v1961_v30, %s1791_s15 }
 0x3c9   :  { %v294_v49 = vpop.xlane.xlu1 %293 }
 0x3ca   :  { %v298_v51 = vsub.f32 %v237_v36, %v294_v49 }
 0x3cc   :  { %v300_v52 = vmul.f32 1.442695, %v298_v51 }
 0x3cd   :  { %v297_v53 = vpop.xlane.xlu0 %296  ;;  %v414_v4 = vpop.permute.xlu1 %413 }
 0x3ce   :  { %1726 = vpow2.f32 %v300_v52  ;;  %v299_v55 = vsub.f32 %v286_v44, %v297_v53  ;;  %v419_v8 = vsel %vm195_vm2, %v414_v4, 0 }
 0x3d0   :  { %v302_v56 = vmul.f32 1.442695, %v299_v55 }
 0x3d1   :  { %v412_v14 = vpop.permute.xlu1 %411 }
 0x3d2   :  { %1728 = vpow2.f32 %v302_v56 }
 0x3d5   :  { %v463_v15 = vpop.permute.xlu1 %462 }
 0x3db   :  { %v1727_v57 = vpop.eup %1726 }
 0x3dc   :  { %v304_v58 = vsel %vm291_vm5, %v1727_v57, 0.0 }
 0x3dd   :  { %305 = vadd.xlane.f32.xlu0 %v304_v58 }
 0x3df   :  { %v1729_v59 = vpop.eup %1728 }
 0x3e0   :  { %v307_v60 = vsel %vm291_vm5, %v1729_v59, 0.0 }
 0x3e1   :  { %308 = vadd.xlane.f32.xlu0 %v307_v60 }
 0x3f7   :  { %464 = vrot.lane.b32.xlu0 %v1937_v9, %s1790_s1 }
 0x466   :  { %v306_v61 = vpop.xlane.xlu0 %305 }
 0x467   :  { %1730 = vrcp.f32 %v306_v61 }
 0x46a   :  { %v309_v62 = vpop.xlane.xlu0 %308 }
 0x46b   :  { %1732 = vrcp.f32 %v309_v62 }
 0x46e   :  { %v465_v11 = vpop.permute.xlu0 %464 }
 0x46f   :  { %v470_v13 = vsel %vm195_vm2, %v465_v11, 0 }
 0x474   :  { %v1731_v2 = vpop.eup %1730 }
 0x475   :  { %v312_v3 = vmul.f32 %v1731_v2, %v1727_v57 }
 0x477   :  { %v314_v5 = vpack.c.bf16 %v312_v3, %v312_v3 }
 0x478   :  { %v1733_v7 = vpop.eup %1732 }
 0x479   :  { %1603 = vmatmul.mubr.msk.bf16.vlgmr.msra.gmra.mxu0 %vm291_vm5, %v314_v5  ;;  %v313_v10 = vmul.f32 %v1733_v7, %v1729_v59  ;;  %v174_v5 = vld [vmem:[%s2346_s2] sm:$0xff]  ;;  %v175_v7 = vld [vmem:[%s2346_s2 + $0x8] sm:$0xff] }
 0x47a   :  { %1613 = vmatpush3.bf16.xpose.msra.mxu0 %v419_v8  ;;  %1614 = vmatprep.mubr.msk.bf16.mxu0 %vm1788_vm1, %v1787_v63  ;;  %v182_v11 = vpack.c.bf16 %v175_v7, %v174_v5 }
 0x47b   :  { %v315_v12 = vpack.c.bf16 %v313_v10, %v313_v10  ;;  %1624 = vmatprep.subr.bf16.mxu0 %v1787_v63 }
 0x47d   :  { %1609 = vmatmul.mubr.msk.bf16.vlgmr.msra.gmra.mxu1 %vm291_vm5, %v315_v12 }
 0x47e   :  { %1619 = vmatpush3.bf16.xpose.msra.mxu1 %v470_v13  ;;  %1620 = vmatprep.mubr.msk.bf16.mxu1 %vm1788_vm1, %v1787_v63 }
 0x47f   :  { %1630 = vmatprep.subr.bf16.mxu1 %v1787_v63 }
 0x481   :  { %1615 = vmatmul.mubr.msk.bf16.vlgmr.msra.gmra.mxu0 %vm195_vm2, %v412_v14 }
 0x482   :  { %1626 = vmatprep.mubr.msk.bf16.mxu0 %vm1788_vm1, %v1787_v63 }
 0x485   :  { %1621 = vmatmul.mubr.msk.bf16.vlgmr.msra.gmra.mxu1 %vm195_vm2, %v463_v15 }
 0x486   :  { %1632 = vmatprep.mubr.msk.bf16.mxu1 %vm1788_vm1, %v1787_v63 }
 0x539   :  { %v2003_v16 = vpop.f32.mrf.mxu0 }
 0x53b   :  { %v1604_v17 = vpop.f32.mrf.mxu0 }
 0x53d   :  { %v360_v18 = vpop.f32.mrf.mxu0  ;;  %v2005_v19 = vpop.f32.mrf.mxu1 }
 0x53e   :  { %v409_v20 = vpack.c.bf16 %v2005_v19, %v2003_v16  ;;  %v176_v18 = vld [vmem:[%s2346_s2 + $0x10] sm:$0xff]  ;;  %v177_v16 = vld [vmem:[%s2346_s2 + $0x18] sm:$0xff] }
 0x53f   :  { %v1605_v22 = vpop.f32.mrf.mxu0  ;;  %v1610_v24 = vpop.f32.mrf.mxu1  ;;  %v183_v19 = vpack.c.bf16 %v177_v16, %v176_v18 }
 0x541   :  { %v406_v25 = vpop.f32.mrf.mxu1  ;;  %v455_v27 = vpop.f32.mrf.mxu0 }
 0x542   :  { %v456_v29 = vadd.f32 %v455_v27, %v1973_v34 }
 0x543   :  { %v1611_v31 = vpop.f32.mrf.mxu1  ;;  %v1616_v32 = vpop.f32.mrf.mxu0 }
 0x544   :  { %v512_v33 = vsel %vm291_vm5, %v456_v29, -inf }
 0x545   :  { %513 = vmax.xlane.f32.xlu1 %v512_v33  ;;  %v458_v35 = vpop.f32.mrf.mxu0  ;;  %v506_v36 = vpop.f32.mrf.mxu1 }
 0x546   :  { %v507_v37 = vadd.f32 %v506_v36, %v1973_v34 }
 0x547   :  { %v1617_v38 = vpop.f32.mrf.mxu0  ;;  %v1622_v41 = vpop.f32.mrf.mxu1 }
 0x548   :  { %v515_v43 = vsel %vm291_vm5, %v507_v37, -inf }
 0x549   :  { %516 = vmax.xlane.f32.xlu0 %v515_v43  ;;  %v509_v44 = vpop.f32.mrf.mxu1 }
 0x54b   :  { %v1623_v45 = vpop.f32.mrf.mxu1 }
 0x556   :  { %537 = vrot.lane.b32.xlu1 %v1947_v23, %s1791_s15 }
 0x55a   :  { %725 = vrot.lane.b32.xlu1 %v1933_v6, %s1792_s16 }
 0x55e   :  { %775 = vrot.lane.b32.xlu1 %v1937_v9, %s1792_s16 }
 0x562   :  { %723 = vrot.lane.b32.xlu1 %v1950_v26, %s1793_s17 }
 0x5ce   :  { %v514_v46 = vpop.xlane.xlu1 %513 }
 0x5cf   :  { %v518_v39 = vsub.f32 %v456_v29, %v514_v46 }
 0x5d1   :  { %v520_v47 = vmul.f32 1.442695, %v518_v39 }
 0x5d2   :  { %v517_v48 = vpop.xlane.xlu0 %516  ;;  %v538_v49 = vpop.permute.xlu1 %537 }
 0x5d3   :  { %1734 = vpow2.f32 %v520_v47  ;;  %v519_v51 = vsub.f32 %v507_v37, %v517_v48  ;;  %v543_v52 = vsel %vm319_vm3, %v538_v49, 0 }
 0x5d4   :  { %1625 = vmatpush3.bf16.msra.mxu0 %v543_v52 }
 0x5d5   :  { %v522_v53 = vmul.f32 1.442695, %v519_v51  ;;  %1636 = vmatprep.subr.bf16.mxu0 %v1787_v63 }
 0x5d6   :  { %v726_v13 = vpop.permute.xlu1 %725 }
 0x5d7   :  { %1736 = vpow2.f32 %v522_v53  ;;  %v731_v32 = vsel %vm195_vm2, %v726_v13, 0 }
 0x5da   :  { %v776_v14 = vpop.permute.xlu1 %775 }
 0x5db   :  { %v781_v15 = vsel %vm195_vm2, %v776_v14, 0 }
 0x5de   :  { %v724_v37 = vpop.permute.xlu1 %723 }
 0x5e0   :  { %v1735_v55 = vpop.eup %1734 }
 0x5e1   :  { %v524_v56 = vsel %vm291_vm5, %v1735_v55, 0.0 }
 0x5e2   :  { %525 = vadd.xlane.f32.xlu0 %v524_v56 }
 0x5e4   :  { %v1737_v57 = vpop.eup %1736 }
 0x5e5   :  { %v527_v58 = vsel %vm291_vm5, %v1737_v57, 0.0 }
 0x5e6   :  { %528 = vadd.xlane.f32.xlu0 %v527_v58 }
 0x5fc   :  { %586 = vrot.lane.b32.xlu0 %v1953_v28, %s1791_s15 }
 0x600   :  { %773 = vrot.lane.b32.xlu0 %v1961_v30, %s1793_s17 }
 0x66b   :  { %v526_v59 = vpop.xlane.xlu0 %525 }
 0x66c   :  { %1738 = vrcp.f32 %v526_v59 }
 0x66f   :  { %v529_v60 = vpop.xlane.xlu0 %528 }
 0x670   :  { %1740 = vrcp.f32 %v529_v60 }
 0x673   :  { %v587_v61 = vpop.permute.xlu0 %586 }
 0x674   :  { %v592_v62 = vsel %vm319_vm3, %v587_v61, 0 }
 0x675   :  { %1631 = vmatpush3.bf16.msra.mxu1 %v592_v62 }
 0x676   :  { %1642 = vmatprep.subr.bf16.mxu1 %v1787_v63 }
 0x677   :  { %v774_v17 = vpop.permute.xlu0 %773 }
 0x679   :  { %v1739_v2 = vpop.eup %1738 }
 0x67a   :  { %v532_v3 = vmul.f32 %v1739_v2, %v1735_v55 }
 0x67c   :  { %v534_v4 = vpack.c.bf16 %v532_v3, %v532_v3 }
 0x67d   :  { %v1741_v8 = vpop.eup %1740 }
 0x67e   :  { %1627 = vmatmul.mubr.msk.bf16.vlgmr.msra.gmra.mxu0 %vm291_vm5, %v534_v4  ;;  %v533_v10 = vmul.f32 %v1741_v8, %v1737_v57 }
 0x67f   :  { %1638 = vmatprep.mubr.msk.bf16.mxu0 %vm1788_vm1, %v1787_v63  ;;  %1637 = vmatpush3.bf16.msra.mxu0 %v183_v19 }
 0x680   :  { %v535_v12 = vpack.c.bf16 %v533_v10, %v533_v10  ;;  %1648 = vmatprep.subr.bf16.mxu0 %v1787_v63 }
 0x682   :  { %1633 = vmatmul.mubr.msk.bf16.vlgmr.msra.gmra.mxu1 %vm291_vm5, %v535_v12 }
 0x683   :  { %1643 = vmatpush3.bf16.msra.mxu1 %v182_v11  ;;  %1644 = vmatprep.mubr.msk.bf16.mxu1 %vm1788_vm1, %v1787_v63 }
 0x684   :  { %1654 = vmatprep.subr.bf16.mxu1 %v1787_v63 }
 0x68a   :  { %1645 = vmatmul.mubr.msk.bf16.vlgmr.msra.gmra.mxu1 %vm195_vm2, %v409_v20 }
 0x68b   :  { %1655 = vmatpush3.bf16.xpose.msra.mxu1 %v781_v15  ;;  %1656 = vmatprep.mubr.msk.bf16.mxu1 %vm1788_vm1, %v1787_v63 }
 0x68c   :  { %1666 = vmatprep.subr.bf16.mxu1 %v1787_v63 }
 0x692   :  { %1657 = vmatmul.mubr.msk.bf16.vlgmr.msra.gmra.mxu1 %vm195_vm2, %v774_v17 }
 0x693   :  { %1668 = vmatprep.mubr.msk.bf16.mxu1 %vm1788_vm1, %v1787_v63 }
 0x73e   :  { %v579_v20 = vpop.f32.mrf.mxu0 }
 0x740   :  { %v1628_v22 = vpop.f32.mrf.mxu0 }
 0x742   :  { %v582_v24 = vpop.f32.mrf.mxu0  ;;  %v628_v25 = vpop.f32.mrf.mxu1 }
 0x743   :  { %v634_v27 = vpack.c.bf16 %v628_v25, %v579_v20 }
 0x744   :  { %v1629_v29 = vpop.f32.mrf.mxu0  ;;  %v1634_v31 = vpop.f32.mrf.mxu1 }
 0x745   :  { %1639 = vmatmul.mubr.msk.bf16.vlgmr.msra.gmra.mxu0 %vm195_vm2, %v634_v27  ;;  %v178_v27 = vld [vmem:[%s2346_s2 + $0x20] sm:$0xff]  ;;  %v179_v29 = vld [vmem:[%s2346_s2 + $0x28] sm:$0xff] }
 0x746   :  { %1649 = vmatpush3.bf16.xpose.msra.mxu0 %v731_v32  ;;  %v631_v33 = vpop.f32.mrf.mxu1  ;;  %1650 = vmatprep.mubr.msk.bf16.mxu0 %vm1788_vm1, %v1787_v63  ;;  %v184_v31 = vpack.c.bf16 %v179_v29, %v178_v27 }
 0x747   :  { %1660 = vmatprep.subr.bf16.mxu0 %v1787_v63 }
 0x748   :  { %v1635_v35 = vpop.f32.mrf.mxu1 }
 0x74a   :  { %v2065_v36 = vpop.f32.mrf.mxu1 }
 0x74c   :  { %v1646_v38 = vpop.f32.mrf.mxu1 }
 0x74d   :  { %1651 = vmatmul.mubr.msk.bf16.vlgmr.msra.gmra.mxu0 %vm195_vm2, %v724_v37 }
 0x74e   :  { %v2068_v41 = vpop.f32.mrf.mxu1  ;;  %1662 = vmatprep.mubr.msk.bf16.mxu0 %vm1788_vm1, %v1787_v63 }
 0x750   :  { %v1647_v43 = vpop.f32.mrf.mxu1 }
 0x752   :  { %v817_v44 = vpop.f32.mrf.mxu1 }
 0x753   :  { %v818_v45 = vadd.f32 %v817_v44, %v1973_v34 }
 0x754   :  { %v1658_v46 = vpop.f32.mrf.mxu1 }
 0x755   :  { %v826_v39 = vsel %vm291_vm5, %v818_v45, -inf }
 0x756   :  { %827 = vmax.xlane.f32.xlu0 %v826_v39  ;;  %v820_v47 = vpop.f32.mrf.mxu1 }
 0x758   :  { %v1659_v48 = vpop.f32.mrf.mxu1 }
 0x7df   :  { %v828_v49 = vpop.xlane.xlu0 %827 }
 0x7e0   :  { %v830_v51 = vsub.f32 %v818_v45, %v828_v49 }
 0x7e2   :  { %v833_v52 = vmul.f32 1.442695, %v830_v51 }
 0x7e4   :  { %1742 = vpow2.f32 %v833_v52 }
 0x7f1   :  { %v1743_v53 = vpop.eup %1742 }
 0x7f2   :  { %v838_v55 = vsel %vm291_vm5, %v1743_v53, 0.0 }
 0x7f3   :  { %839 = vadd.xlane.f32.xlu0 %v838_v55 }
 0x805   :  { %v2075_v56 = vpop.f32.mrf.mxu0 }
 0x807   :  { %v1640_v57 = vpop.f32.mrf.mxu0 }
 0x809   :  { %v2077_v58 = vpop.f32.mrf.mxu0 }
 0x80b   :  { %v1641_v59 = vpop.f32.mrf.mxu0 }
 0x80d   :  { %v767_v60 = vpop.f32.mrf.mxu0 }
 0x80e   :  { %v768_v61 = vadd.f32 %v767_v60, %v1973_v34 }
 0x80f   :  { %v1652_v62 = vpop.f32.mrf.mxu0 }
 0x810   :  { %v823_v2 = vsel %vm291_vm5, %v768_v61, -inf }
 0x811   :  { %824 = vmax.xlane.f32.xlu1 %v823_v2  ;;  %v770_v3 = vpop.f32.mrf.mxu0  ;;  %v717_v2 = vadd.f32 %v2065_v36, %v2075_v56 }
 0x813   :  { %v1653_v4 = vpop.f32.mrf.mxu0 }
 0x822   :  { %847 = vrot.lane.b32.xlu1 %v1947_v23, %s1793_s17 }
 0x826   :  { %992 = vrot.lane.b32.xlu1 %v1933_v6, %s1794_s26 }
 0x82a   :  { %1042 = vrot.lane.b32.xlu1 %v1937_v9, %s1794_s26 }
 0x82e   :  { %990 = vrot.lane.b32.xlu1 %v1950_v26, %s1795_s27 }
 0x87c   :  { %v840_v6 = vpop.xlane.xlu0 %839 }
 0x89a   :  { %v825_v5 = vpop.xlane.xlu1 %824 }
 0x89b   :  { %v829_v7 = vsub.f32 %v768_v61, %v825_v5 }
 0x89d   :  { %v831_v8 = vmul.f32 1.442695, %v829_v7  ;;  %v720_v7 = vadd.f32 %v2068_v41, %v2077_v58 }
 0x89e   :  { %v848_v10 = vpop.permute.xlu1 %847 }
 0x89f   :  { %1744 = vpow2.f32 %v831_v8  ;;  %v853_v11 = vsel %vm319_vm3, %v848_v10, 0 }
 0x8a0   :  { %1661 = vmatpush3.bf16.msra.mxu0 %v853_v11  ;;  %1746 = vrcp.f32 %v840_v6 }
 0x8a1   :  { %1672 = vmatprep.subr.bf16.mxu0 %v1787_v63 }
 0x8a2   :  { %v993_v15 = vpop.permute.xlu1 %992 }
 0x8a3   :  { %v998_v19 = vsel %vm195_vm2, %v993_v15, 0 }
 0x8a6   :  { %v1043_v20 = vpop.permute.xlu1 %1042 }
 0x8a7   :  { %v1048_v49 = vsel %vm195_vm2, %v1043_v20, 0  ;;  %v180_v20 = vld [vmem:[%s2346_s2 + $0x30] sm:$0xff] }
 0x8aa   :  { %v991_v24 = vpop.permute.xlu1 %990 }
 0x8ac   :  { %v1745_v12 = vpop.eup %1744 }
 0x8ad   :  { %v835_v13 = vsel %vm291_vm5, %v1745_v12, 0.0  ;;  %v1747_v9 = vpop.eup %1746 }
 0x8ae   :  { %836 = vadd.xlane.f32.xlu0 %v835_v13  ;;  %v844_v14 = vmul.f32 %v1747_v9, %v1743_v53 }
 0x8b0   :  { %v846_v16 = vpack.c.bf16 %v844_v14, %v844_v14 }
 0x8c4   :  { %895 = vrot.lane.b32.xlu0 %v1953_v28, %s1793_s17 }
 0x8c8   :  { %1040 = vrot.lane.b32.xlu0 %v1961_v30, %s1795_s27 }
 0x937   :  { %v837_v26 = vpop.xlane.xlu0 %836 }
 0x938   :  { %1748 = vrcp.f32 %v837_v26 }
 0x93b   :  { %v896_v17 = vpop.permute.xlu0 %895 }
 0x93c   :  { %v901_v18 = vsel %vm319_vm3, %v896_v17, 0 }
 0x93d   :  { %1667 = vmatpush3.bf16.msra.mxu1 %v901_v18 }
 0x93e   :  { %1678 = vmatprep.subr.bf16.mxu1 %v1787_v63 }
 0x93f   :  { %v1041_v55 = vpop.permute.xlu0 %1040 }
 0x940   :  { %1669 = vmatmul.mubr.msk.bf16.vlgmr.msra.gmra.mxu1 %vm291_vm5, %v846_v16 }
 0x941   :  { %1679 = vmatpush3.bf16.xpose.msra.mxu1 %v998_v19  ;;  %1680 = vmatprep.mubr.msk.bf16.mxu1 %vm1788_vm1, %v1787_v63 }
 0x942   :  { %1690 = vmatprep.subr.bf16.mxu1 %v1787_v63 }
 0x945   :  { %v1749_v30 = vpop.eup %1748 }
 0x946   :  { %v843_v22 = vmul.f32 %v1749_v30, %v1745_v12  ;;  %v181_v30 = vld [vmem:[%s2346_s2 + $0x38] sm:$0xff] }
 0x948   :  { %1681 = vmatmul.mubr.msk.bf16.vlgmr.msra.gmra.mxu1 %vm195_vm2, %v991_v24  ;;  %v845_v25 = vpack.c.bf16 %v843_v22, %v843_v22  ;;  %v185_v22 = vpack.c.bf16 %v181_v30, %v180_v20  ;;  %v1307_v20 = vld [vmem:[%s2347_s3 + $0x18] sm:$0xff]  ;;  %v1304_v30 = vld [vmem:[%s2347_s3] sm:$0xff] }
 0x949   :  { %1692 = vmatprep.mubr.msk.bf16.mxu1 %vm1788_vm1, %v1787_v63 }
 0x94a   :  { %1663 = vmatmul.mubr.msk.bf16.vlgmr.msra.gmra.mxu0 %vm291_vm5, %v845_v25 }
 0x94b   :  { %1674 = vmatprep.mubr.msk.bf16.mxu0 %vm1788_vm1, %v1787_v63  ;;  %1673 = vmatpush3.bf16.msra.mxu0 %v184_v31 }
 0x94c   :  { %1684 = vmatprep.subr.bf16.mxu0 %v1787_v63 }
 0xa00   :  { %v937_v32 = vpop.f32.mrf.mxu1 }
 0xa02   :  { %v1670_v33 = vpop.f32.mrf.mxu1 }
 0xa04   :  { %v940_v35 = vpop.f32.mrf.mxu1 }
 0xa06   :  { %v1671_v37 = vpop.f32.mrf.mxu1 }
 0xa08   :  { %v1034_v38 = vpop.f32.mrf.mxu1 }
 0xa09   :  { %v1035_v43 = vadd.f32 %v1034_v38, %v1973_v34 }
 0xa0a   :  { %v889_v44 = vpop.f32.mrf.mxu0  ;;  %v1682_v45 = vpop.f32.mrf.mxu1 }
 0xa0b   :  { %v943_v46 = vpack.c.bf16 %v937_v32, %v889_v44  ;;  %v1090_v39 = vsel %vm291_vm5, %v1035_v43, -inf }
 0xa0c   :  { %1091 = vmax.xlane.f32.xlu1 %v1090_v39  ;;  %v1664_v47 = vpop.f32.mrf.mxu0  ;;  %v1037_v48 = vpop.f32.mrf.mxu1 }
 0xa0d   :  { %1675 = vmatmul.mubr.msk.bf16.vlgmr.msra.gmra.mxu0 %vm195_vm2, %v943_v46  ;;  %v1261_v46 = vsub.s32 7, %v1907_v40 }
 0xa0e   :  { %1685 = vmatpush3.bf16.xpose.msra.mxu0 %v1048_v49  ;;  %v892_v51 = vpop.f32.mrf.mxu0  ;;  %v1683_v52 = vpop.f32.mrf.mxu1  ;;  %1686 = vmatprep.mubr.msk.bf16.mxu0 %vm1788_vm1, %v1787_v63 }
 0xa0f   :  { %1696 = vmatprep.subr.bf16.mxu0 %v1787_v63  ;;  %v1262_v48 = vrot.slane %v1913_v42, %v1261_v46 }
 0xa10   :  { %v1665_v53 = vpop.f32.mrf.mxu0 }
 0xa15   :  { %1687 = vmatmul.mubr.msk.bf16.vlgmr.msra.gmra.mxu0 %vm195_vm2, %v1041_v55 }
 0xa16   :  { %1698 = vmatprep.mubr.msk.bf16.mxu0 %vm1788_vm1, %v1787_v63 }
 0xa1d   :  { %1114 = vrot.lane.b32.xlu1 %v1947_v23, %s1795_s27 }
 0xa95   :  { %v1092_v57 = vpop.xlane.xlu1 %1091 }
 0xa96   :  { %v1096_v61 = vsub.f32 %v1035_v43, %v1092_v57 }
 0xa98   :  { %v1098_v62 = vmul.f32 1.442695, %v1096_v61 }
 0xa99   :  { %v1115_v59 = vpop.permute.xlu1 %1114 }
 0xa9a   :  { %v1120_v60 = vsel %vm319_vm3, %v1115_v59, 0  ;;  %1750 = vpow2.f32 %v1098_v62 }
 0xa9b   :  { %1691 = vmatpush3.bf16.msra.mxu1 %v1120_v60 }
 0xa9c   :  { %1702 = vmatprep.subr.bf16.mxu1 %v1787_v63 }
 0xaa7   :  { %v1751_v9 = vpop.eup %1750 }
 0xaa8   :  { %v1102_v56 = vsel %vm291_vm5, %v1751_v9, 0.0 }
 0xacd   :  { %v981_v3 = vpop.f32.mrf.mxu0 }
 0xace   :  { %v988_v4 = vadd.f32 %v981_v3, %v717_v2 }
 0xacf   :  { %v1676_v5 = vpop.f32.mrf.mxu0 }
 0xad1   :  { %v984_v23 = vpop.f32.mrf.mxu0 }
 0xad2   :  { %v989_v8 = vadd.f32 %v984_v23, %v720_v7 }
 0xad3   :  { %v1677_v10 = vpop.f32.mrf.mxu0 }
 0xad4   :  { %v1319_v10 = vld [vmem:[%s2347_s3 + $0x78] sm:$0xff] }
 0xad5   :  { %v1084_v11 = vpop.f32.mrf.mxu0 }
 0xad6   :  { %v1085_v12 = vadd.f32 %v1084_v11, %v1973_v34 }
 0xad7   :  { %v1688_v13 = vpop.f32.mrf.mxu0 }
 0xad8   :  { %v1093_v6 = vsel %vm291_vm5, %v1085_v12, -inf  ;;  %v1318_v13 = vld [vmem:[%s2347_s3 + $0x70] sm:$0xff] }
 0xad9   :  { %1094 = vmax.xlane.f32.xlu0 %v1093_v6  ;;  %v1087_v26 = vpop.f32.mrf.mxu0 }
 0xada   :  { %v1315_v26 = vld [vmem:[%s2347_s3 + $0x58] sm:$0xff] }
 0xadb   :  { %v1689_v36 = vpop.f32.mrf.mxu0 }
 0xadd   :  { %1103 = vadd.xlane.f32.xlu0 %v1102_v56  ;;  %v1312_v56 = vld [vmem:[%s2347_s3 + $0x40] sm:$0xff] }
 0xb62   :  { %v1095_v14 = vpop.xlane.xlu0 %1094 }
 0xb63   :  { %v1097_v15 = vsub.f32 %v1085_v12, %v1095_v14  ;;  %v1316_v12 = vld [vmem:[%s2347_s3 + $0x60] sm:$0xff]  ;;  %v1314_v14 = vld [vmem:[%s2347_s3 + $0x50] sm:$0xff] }
 0xb64   :  { %v1326_v6 = vpack.c.bf16 %v1318_v13, %v1316_v12  ;;  %v1293_v12 = vsub.s32 2, %v1907_v40 }
 0xb65   :  { %v1100_v17 = vmul.f32 1.442695, %v1097_v15  ;;  %v1324_v15 = vpack.c.bf16 %v1314_v14, %v1312_v56 }
 0xb66   :  { %v1104_v41 = vpop.xlane.xlu0 %1103 }
 0xb67   :  { %1752 = vpow2.f32 %v1100_v17  ;;  %v1309_v17 = vld [vmem:[%s2347_s3 + $0x28] sm:$0xff] }
 0xb68   :  { %1754 = vrcp.f32 %v1104_v41  ;;  %v1311_v41 = vld [vmem:[%s2347_s3 + $0x38] sm:$0xff] }
 0xb74   :  { %v1753_v58 = vpop.eup %1752 }
 0xb75   :  { %v1755_v18 = vpop.eup %1754  ;;  %v1105_v34 = vsel %vm291_vm5, %v1753_v58, 0.0 }
 0xb76   :  { %1106 = vadd.xlane.f32.xlu0 %v1105_v34  ;;  %v1110_v16 = vmul.f32 %v1755_v18, %v1751_v9  ;;  %v1313_v9 = vld [vmem:[%s2347_s3 + $0x48] sm:$0xff]  ;;  %v1308_v18 = vld [vmem:[%s2347_s3 + $0x20] sm:$0xff]  ;;  %v1310_v34 = vld [vmem:[%s2347_s3 + $0x30] sm:$0xff] }
 0xb77   :  { %v1325_v36 = vpack.c.bf16 %v1315_v26, %v1313_v9  ;;  %v1762_v9 = vld [vmem:[%s2349_s5] sm:$0xff] }
 0xb78   :  { %v1112_v19 = vpack.c.bf16 %v1110_v16, %v1110_v16  ;;  %v1322_v16 = vpack.c.bf16 %v1310_v34, %v1308_v18  ;;  %v1294_v26 = vrot.slane %v1762_v9, %v1293_v12 }
 0xb7a   :  { %1693 = vmatmul.mubr.msk.bf16.vlgmr.msra.gmra.mxu1 %vm291_vm5, %v1112_v19  ;;  %v1305_v19 = vld [vmem:[%s2347_s3 + $0x8] sm:$0xff] }
 0xb7b   :  { %1704 = vmatprep.mubr.msk.bf16.mxu1 %vm1788_vm1, %v1787_v63  ;;  %1703 = vmatpush3.bf16.msra.mxu1 %v185_v22  ;;  %v1321_v22 = vpack.c.bf16 %v1307_v20, %v1305_v19  ;;  %v1396_v20 = vld [vmem:[%s2348_s4 + $0x28] sm:$0xff] }
 0xb8c   :  { %1162 = vrot.lane.b32.xlu0 %v1953_v28, %s1795_s27 }
 0xbff   :  { %v1107_v24 = vpop.xlane.xlu0 %1106 }
 0xc00   :  { %1756 = vrcp.f32 %v1107_v24  ;;  %v1306_v24 = vld [vmem:[%s2347_s3 + $0x10] sm:$0xff] }
 0xc03   :  { %v1163_v25 = vpop.permute.xlu0 %1162 }
 0xc04   :  { %v1168_v27 = vsel %vm319_vm3, %v1163_v25, 0  ;;  %v1320_v25 = vpack.c.bf16 %v1306_v24, %v1304_v30  ;;  %v1410_v24 = vld [vmem:[%s2348_s4 + $0x98] sm:$0xff] }
 0xc05   :  { %1697 = vmatpush3.bf16.msra.mxu0 %v1168_v27  ;;  %v1421_v27 = vld [vmem:[%s2348_s4 + $0xf0] sm:$0xff] }
 0xc0d   :  { %v1757_v63 = vpop.eup %1756 }
 0xc0e   :  { %v1111_v29 = vmul.f32 %v1757_v63, %v1753_v58  ;;  %v1323_v58 = vpack.c.bf16 %v1311_v41, %v1309_v17  ;;  %v1422_v63 = vld [vmem:[%s2348_s4 + $0xf8] sm:$0xff] }
 0xc10   :  { %v1113_v31 = vpack.c.bf16 %v1111_v29, %v1111_v29  ;;  %v1405_v29 = vld [vmem:[%s2348_s4 + $0x70] sm:$0xff] }
 0xc12   :  { %1699 = vmatmul.mubr.msk.bf16.vlgmr.msra.gmra.mxu0 %vm291_vm5, %v1113_v31  ;;  %v1438_v31 = vpack.c.bf16 %v1422_v63, %v1421_v27  ;;  %v1393_v27 = vld [vmem:[%s2348_s4 + $0x10] sm:$0xff]  ;;  %v1394_v63 = vld [vmem:[%s2348_s4 + $0x18] sm:$0xff] }
 0xc13   :  { %1374 = vmatprep.mubr.bf16.mxu0 %v1785_v21 }
 0xc14   :  { %1566 = vmatprep.subr.bf16.mxu1 %v1438_v31  ;;  %v1407_v31 = vld [vmem:[%s2348_s4 + $0x80] sm:$0xff] }
 0xc3a   :  { %v1156_v28 = vpop.f32.mrf.mxu1 }
 0xc3c   :  { %v1694_v32 = vpop.f32.mrf.mxu1 }
 0xc3d   :  { %v1419_v32 = vld [vmem:[%s2348_s4 + $0xe0] sm:$0xff] }
 0xc3e   :  { %v1159_v33 = vpop.f32.mrf.mxu1 }
 0xc3f   :  { %v1420_v33 = vld [vmem:[%s2348_s4 + $0xe8] sm:$0xff] }
 0xc40   :  { %v1695_v35 = vpop.f32.mrf.mxu1 }
 0xcd2   :  { %v1204_v37 = vpop.f32.mrf.mxu0 }
 0xcd3   :  { %v1210_v38 = vpack.c.bf16 %v1204_v37, %v1156_v28  ;;  %v1406_v28 = vld [vmem:[%s2348_s4 + $0x78] sm:$0xff]  ;;  %v1437_v37 = vpack.c.bf16 %v1420_v33, %v1419_v32  ;;  %v1391_v33 = vld [vmem:[%s2348_s4] sm:$0xff] }
 0xcd4   :  { %v1700_v43 = vpop.f32.mrf.mxu0  ;;  %v1430_v35 = vpack.c.bf16 %v1406_v28, %v1405_v29  ;;  %v1424_v29 = vpack.c.bf16 %v1394_v63, %v1393_v27  ;;  %v1408_v28 = vld [vmem:[%s2348_s4 + $0x88] sm:$0xff] }
 0xcd5   :  { %1705 = vmatmul.mubr.msk.bf16.vlgmr.msra.gmra.mxu1 %vm195_vm2, %v1210_v38  ;;  %v1403_v38 = vld [vmem:[%s2348_s4 + $0x60] sm:$0xff]  ;;  %v1404_v43 = vld [vmem:[%s2348_s4 + $0x68] sm:$0xff]  ;;  %v1431_v32 = vpack.c.bf16 %v1408_v28, %v1407_v31 }
 0xcd6   :  { %v1207_v44 = vpop.f32.mrf.mxu0  ;;  %1567 = vmatpush3.bf16.msra.mxu1 %v1430_v35  ;;  %v1429_v46 = vpack.c.bf16 %v1404_v43, %v1403_v38  ;;  %v1392_v35 = vld [vmem:[%s2348_s4 + $0x8] sm:$0xff]  ;;  %v32_v38 = vld [vmem:[%s2350_s6] sm:$0x3] }
 0xcd7   :  { %v1417_v44 = vld [vmem:[%s2348_s4 + $0xd0] sm:$0xff]  ;;  %1568 = vmatprep.subr.bf16.mxu1 %v1437_v37  ;;  %v1423_v37 = vpack.c.bf16 %v1392_v35, %v1391_v33 }
 0xcd8   :  { %v1701_v45 = vpop.f32.mrf.mxu0 }
 0xcd9   :  { %v1418_v45 = vld [vmem:[%s2348_s4 + $0xd8] sm:$0xff] }
 0xcda   :  { %1569 = vmatpush3.bf16.msra.mxu1 %v1429_v46 }
 0xd95   :  { %v1248_v39 = vpop.f32.mrf.mxu1 }
 0xd96   :  { %v1255_v47 = vadd.f32 %v1248_v39, %v988_v4  ;;  %v1436_v39 = vpack.c.bf16 %v1418_v45, %v1417_v44  ;;  %v1336_v44 = vrot.slane %v32_v38, %v69_v54  ;;  %v1332_v45 = vrot.slane %v32_v38, %v1918_v50 }
 0xd97   :  { %v1706_v49 = vpop.f32.mrf.mxu1 }
 0xd98   :  { %v1257_v21 = vadd.f32 %v1255_v47, %v1842_v0  ;;  %v1401_v47 = vld [vmem:[%s2348_s4 + $0x50] sm:$0xff]  ;;  %v1415_v49 = vld [vmem:[%s2348_s4 + $0xc0] sm:$0xff]  ;;  %1570 = vmatprep.subr.bf16.mxu1 %v1436_v39 }
 0xd99   :  { %v1251_v51 = vpop.f32.mrf.mxu1 }
 0xd9a   :  { %v2154_v52 = vadd.f32 %v1262_v48, %v1257_v21  ;;  %v1256_v53 = vadd.f32 %v1251_v51, %v989_v8  ;;  %v1317_v8 = vld [vmem:[%s2347_s3 + $0x68] sm:$0xff] }
 0xd9b   :  { %v1707_v55 = vpop.f32.mrf.mxu1  ;;  %v1327_v11 = vpack.c.bf16 %v1319_v10, %v1317_v8  ;;  %v1416_v21 = vld [vmem:[%s2348_s4 + $0xc8] sm:$0xff] }
 0xd9c   :  { %v1258_v57 = vadd.f32 %v1256_v53, %v1847_v1  ;;  %v1265_v59 = vsel %vm33_vm0, %v2154_v52, 0.0  ;;  %v1435_v53 = vpack.c.bf16 %v1416_v21, %v1415_v49  ;;  %v1399_v55 = vld [vmem:[%s2348_s4 + $0x40] sm:$0xff] }
 0xd9d   :  { %1266 = vadd.xlane.f32.xlu1 %v1265_v59  ;;  %1350 = vmatprep.subr.bf16.mxu0 %v1327_v11  ;;  %v1413_v59 = vld [vmem:[%s2348_s4 + $0xb0] sm:$0xff] }
 0xd9e   :  { %v2159_v60 = vadd.f32 %v1262_v48, %v1258_v57  ;;  %1351 = vmatpush1.bf16.msra.mxu0 %v1326_v6  ;;  %v1402_v48 = vld [vmem:[%s2348_s4 + $0x58] sm:$0xff]  ;;  %v1400_v57 = vld [vmem:[%s2348_s4 + $0x48] sm:$0xff] }
 0xd9f   :  { %1352 = vmatprep.subr.bf16.mxu0 %v1325_v36  ;;  %v1428_v51 = vpack.c.bf16 %v1402_v48, %v1401_v47  ;;  %v1299_v36 = vsub.s32 3, %v1907_v40  ;;  %v31_v40 = vld [vmem:[%s2349_s5 + $0x8] sm:$0xff]  ;;  %s1763_s5 = scalar_lea.vmem %s1494_s29, 256 }
 0xda0   :  { %v1268_v61 = vsel %vm33_vm0, %v2159_v60, 0.0  ;;  %p1764_p0 = scmp.ne.s32.totalorder %s1494_s29, %s1763_s5  ;;  %p1769_p2 = scmp.lt.s32.totalorder %s1763_s5, %s1763_s5 }
 0xda1   :  { %1269 = vadd.xlane.f32.xlu0 %v1268_v61  ;;  %v1414_v61 = vld [vmem:[%s2348_s4 + $0xb8] sm:$0xff]  ;;  %1571 = vmatpush3.bf16.msra.mxu1 %v1428_v51  ;;  %v1300_v17 = vrot.slane %v1762_v9, %v1299_v36 }
 0xda2   :  { %1353 = vmatpush1.bf16.msra.mxu0 %v1324_v15  ;;  %1572 = vmatprep.subr.bf16.mxu1 %v1435_v53  ;;  %p1770_p3 = por %p1769_p2, %p1768_p1 }
 0xda3   :  { %1354 = vmatprep.subr.bf16.mxu0 %v1323_v58 }
 0xda4   :  { %p1771_p4 = pnand %p1770_p3, %p1764_p0 }
 0xda6   :  { %1355 = vmatpush1.bf16.msra.mxu0 %v1322_v16  ;;  %v1412_v16 = vld [vmem:[%s2348_s4 + $0xa8] sm:$0xff] }
 0xda7   :  { %1356 = vmatprep.subr.bf16.mxu0 %v1321_v22  ;;  %v1409_v22 = vld [vmem:[%s2348_s4 + $0x90] sm:$0xff] }
 0xdaa   :  { %1357 = vmatpush1.bf16.msra.mxu0 %v1320_v25  ;;  %v1432_v25 = vpack.c.bf16 %v1410_v24, %v1409_v22 }
 0xe26   :  { %v1267_v42 = vpop.xlane.xlu1 %1266 }
 0xe27   :  { %v1271_v62 = vmul.f32 0.015625, %v1267_v42  ;;  %v1427_v42 = vpack.c.bf16 %v1400_v57, %v1399_v55 }
 0xe29   :  { %v2164_v0 = vsub.f32 %v2154_v52, %v1271_v62  ;;  %v1434_v62 = vpack.c.bf16 %v1414_v61, %v1413_v59  ;;  %1573 = vmatpush3.bf16.msra.mxu1 %v1427_v42 }
 0xe2a   :  { %v1270_v2 = vpop.xlane.xlu0 %1269 }
 0xe2b   :  { %v1272_v3 = vmul.f32 0.015625, %v1270_v2  ;;  %v1275_v1 = vmul.f32 %v2164_v0, %v2164_v0  ;;  %v1397_v2 = vld [vmem:[%s2348_s4 + $0x30] sm:$0xff]  ;;  %1574 = vmatprep.subr.bf16.mxu1 %v1434_v62  ;;  %v1442_v62 = vrot.slane %v31_v40, %v1918_v50 }
 0xe2d   :  { %v2169_v4 = vsub.f32 %v2159_v60, %v1272_v3  ;;  %v1277_v5 = vsel %vm33_vm0, %v1275_v1, 0.0  ;;  %v1398_v3 = vld [vmem:[%s2348_s4 + $0x38] sm:$0xff] }
 0xe2e   :  { %1278 = vadd.xlane.f32.xlu1 %v1277_v5  ;;  %v1426_v1 = vpack.c.bf16 %v1398_v3, %v1397_v2 }
 0xe2f   :  { %v1276_v7 = vmul.f32 %v2169_v4, %v2169_v4 }
 0xe30   :  { %1575 = vmatpush3.bf16.msra.mxu1 %v1426_v1 }
 0xe31   :  { %v1280_v23 = vsel %vm33_vm0, %v1276_v7, 0.0 }
 0xe32   :  { %1281 = vadd.xlane.f32.xlu0 %v1280_v23 }
 0xeb7   :  { %v1279_v5 = vpop.xlane.xlu1 %1278 }
 0xeb8   :  { %v1283_v7 = vmul.f32 0.015625, %v1279_v5 }
 0xeba   :  { %v1285_v23 = vadd.f32 1e-05, %v1283_v7 }
 0xebb   :  { %v1282_v8 = vpop.xlane.xlu0 %1281 }
 0xebc   :  { %1758 = vrsqrt.f32 %v1285_v23  ;;  %v1284_v10 = vmul.f32 0.015625, %v1282_v8 }
 0xebe   :  { %v1286_v11 = vadd.f32 1e-05, %v1284_v10 }
 0xec0   :  { %1760 = vrsqrt.f32 %v1286_v11 }
 0xec9   :  { %v1759_v13 = vpop.eup %1758 }
 0xeca   :  { %v1289_v6 = vmul.f32 %v1759_v13, %v2164_v0  ;;  %v1411_v0 = vld [vmem:[%s2348_s4 + $0xa0] sm:$0xff] }
 0xecb   :  { %v1433_v19 = vpack.c.bf16 %v1412_v16, %v1411_v0 }
 0xecc   :  { %v1295_v15 = vmul.f32 %v1294_v26, %v1289_v6 }
 0xecd   :  { %v1761_v56 = vpop.eup %1760  ;;  %1576 = vmatprep.subr.bf16.mxu1 %v1433_v19 }
 0xece   :  { %v1290_v14 = vmul.f32 %v1761_v56, %v2169_v4  ;;  %v1301_v58 = vadd.f32 %v1300_v17, %v1295_v15  ;;  %v1395_v4 = vld [vmem:[%s2348_s4 + $0x20] sm:$0xff] }
 0xecf   :  { %v1425_v30 = vpack.c.bf16 %v1396_v20, %v1395_v4 }
 0xed0   :  { %v1296_v41 = vmul.f32 %v1294_v26, %v1290_v14 }
 0xed1   :  { %1577 = vmatpush3.bf16.msra.mxu1 %v1425_v30 }
 0xed2   :  { %v1302_v18 = vadd.f32 %v1300_v17, %v1296_v41  ;;  %1578 = vmatprep.subr.bf16.mxu1 %v1432_v25 }
 0xed4   :  { %v1303_v34 = vpack.c.bf16 %v1302_v18, %v1301_v58 }
 0xed5   :  { %1579 = vmatpush3.bf16.msra.mxu1 %v1424_v29 }
 0xed6   :  { %1525 = vmatmul.mubr.msk.bf16.vlgmr.msra.gmra.mxu0 %vm33_vm0, %v1303_v34  ;;  %1580 = vmatprep.subr.bf16.mxu1 %v1431_v32 }
 0xed9   :  { %1581 = vmatpush3.bf16.msra.mxu1 %v1423_v37 }
 0xf96   :  { %v1376_v43 = vpop.f32.mrf.mxu0 }
 0xf97   :  { %v1377_v49 = vadd.f32 %v1376_v43, %v1332_v45 }
 0xf98   :  { %v1378_v46 = vpop.f32.mrf.mxu0 }
 0xf99   :  { %v1379_v47 = vadd.f32 %v1378_v46, %v1336_v44  ;;  %v1385_v59 = vmax.f32 %v1377_v49, 0.0 }
 0xf9a   :  { %v1380_v39 = vpop.f32.mrf.mxu0 }
 0xf9b   :  { %v1381_v48 = vadd.f32 %v1380_v39, %v1332_v45  ;;  %v1386_v55 = vmax.f32 %v1379_v47, 0.0 }
 0xf9c   :  { %v1382_v21 = vpop.f32.mrf.mxu0 }
 0xf9d   :  { %v1383_v51 = vadd.f32 %v1382_v21, %v1336_v44  ;;  %v1387_v53 = vmax.f32 %v1381_v48, 0.0 }
 0xf9f   :  { %v1388_v57 = vmax.f32 %v1383_v51, 0.0  ;;  %v1389_v42 = vpack.c.bf16 %v1387_v53, %v1385_v59 }
 0xfa1   :  { %v1390_v61 = vpack.c.bf16 %v1388_v57, %v1386_v55 }
 0xfa3   :  { %1475 = vmatprep.mubr.bf16.mxu1 %v1390_v61 }
 0xfa4   :  { %1476 = vmatmul.mubr.bf16.vlgmr.msra.gmra.mxu1 %v1389_v42 }
0x1064   :  { %v1582_v54 = vpop.f32.mrf.mxu1 }
0x1066   :  { %v1583_v2 = vpop.f32.mrf.mxu1 }
0x1067   :  { %v1584_v3 = vadd.f32 %v1583_v2, %v1582_v54 }
0x1068   :  { %v1585_v1 = vpop.f32.mrf.mxu1 }
0x1069   :  { %v1478_v5 = vadd.f32 %v1584_v3, %v1442_v62 }
0x106a   :  { %v1586_v7 = vpop.f32.mrf.mxu1 }
0x106b   :  { %v1484_v23 = vadd.f32 %v1478_v5, %v2154_v52  ;;  %v1587_v8 = vadd.f32 %v1586_v7, %v1585_v1 }
0x106d   :  { %1486 = vst.msk [vmem:[#allocation2] sm:$0xff] %vm33_vm0, %v1484_v23  ;;  %v1481_v10 = vadd.f32 %v1587_v8, %v1442_v62 }
0x106f   :  { %v1485_v11 = vadd.f32 %v1481_v10, %v2159_v60 }
0x1071   :  { %1487 = vst.msk [vmem:[#allocation2 + $0x8] sm:$0xff] %vm33_vm0, %v1485_v11 }
0x1072   :  { %1774 = shalt.err (!%p1771_p4)
}
0x1073   :  { %s1797_s30 = smov 128   ;;  %s1798_s8 = smov 8  }
0x1074   :  { %1499 = dma.vmem_to_hbm [thread:$0]  %s1494_s29, 256, %s2351_s7, [#allocation3], %s1797_s30, %s1797_s30, %s1798_s8  }
0x1075   :  { %1783 = dma.done.wait [#allocation3], 256  }
0x1076   :  { %1784 = vsyncadd [#allocation3], 4294967040 }
0x1077   :  { %1503 = vsyncpa [#allocation3], 1 }

</bundles_post_ra>
